<compile_context>
chip_gen: v6e
topology: v6e:2x2x1
jax: 0.10.0
libtpu: 0.0.40
codegen_flags: <defaults>
</compile_context>

<pallas_src>
import numpy as np
import jax
import jax.numpy as jnp
from jax.experimental import pallas as pl


# ----------------------------------------------------------------------------
# Host-side helpers (operator construction / synthetic params).
# ----------------------------------------------------------------------------
def interp_matrix(n_in, n_out):
    """(n_out, n_in) bilinear interpolation matrix, align_corners=True."""
    A = np.zeros((n_out, n_in), np.float32)
    if n_out == 1:
        A[0, 0] = 1.0
        return A
    scale = (n_in - 1) / (n_out - 1)
    for i in range(n_out):
        src = i * scale
        lo = min(int(np.floor(src)), n_in - 1)
        hi = min(lo + 1, n_in - 1)
        lam = src - lo
        A[i, lo] += 1.0 - lam
        A[i, hi] += lam
    return A


def _shift_rows(M, dy):
    """out[t] = M[t + dy - 1] if in range else 0 (SAME zero padding)."""
    out = np.zeros_like(M)
    n = M.shape[0]
    for t in range(n):
        s = t + dy - 1
        if 0 <= s < n:
            out[t] = M[s]
    return out


def init_params(key, in_emb_dims, n_comp):
    """Deterministic synthetic parameters (PyTorch weight layouts)."""
    out_c = min(in_emb_dims)
    ks = jax.random.split(key, 4)

    def conv_init(k, cout, cin):
        bound = 1.0 / np.sqrt(cin * 9)
        kw, kb = jax.random.split(k)
        w = jax.random.uniform(kw, (cout, cin, 3, 3), jnp.float32, -bound, bound)
        b = jax.random.uniform(kb, (cout,), jnp.float32, -bound, bound)
        return w, b

    w1, b1 = conv_init(ks[0], out_c, in_emb_dims[0])
    w2, b2 = conv_init(ks[1], out_c, in_emb_dims[1])
    wm, bm = conv_init(ks[2], out_c, out_c * 3)
    wo, bo = conv_init(ks[3], n_comp, out_c)
    return dict(w1=w1, b1=b1, w2=w2, b2=b2, wm=wm, bm=bm, wo=wo, bo=bo,
                gamma=jnp.ones((out_c,), jnp.float32),
                beta=jnp.zeros((out_c,), jnp.float32))


# ----------------------------------------------------------------------------
# The single fused Pallas kernel.
# ----------------------------------------------------------------------------
def _psi_fused_kernel(x1_ref, x2_ref, x3_ref,
                      ust_ref, w1_ref, b1_ref, w2_ref, b2_ref,
                      wm_ref, bm_ref, g_ref, be_ref, at_ref,
                      wo_ref, bo_ref, dst_ref, o_ref):
    B = x1_ref.shape[0]
    out_c = b1_ref.shape[0]
    n_comp = bo_ref.shape[0]
    T = at_ref.shape[1]

    ust = ust_ref[...]            # (6*H*W, H2)  folded up2x+shift+col0 operator
    at = at_ref[...]              # (3*H2, T)    folded time-upsample+shift
    dst = dst_ref[...]            # (3*T, T)     post-BN shift operator
    w1 = w1_ref[...]              # (6*out_c, C1) stacked branch-1 tap weights
    w2 = w2_ref[...]              # (6*out_c, C2)
    wm = wm_ref[...]              # (3*out_c, 3*out_c)
    wo = wo_ref[...]              # (3*n_comp, out_c)
    b1 = b1_ref[...]
    b2 = b2_ref[...]
    bm = bm_ref[...]
    gamma = g_ref[...]
    beta = be_ref[...]
    bo = bo_ref[...]

    def branch(xT, w_all, bias):
        # xT: (Cin, H*W) -> ReLU(conv3x3(up2x(x)))[:, :, 0] as (out_c, H2)
        h = jnp.dot(w_all, xT, preferred_element_type=jnp.float32)      # (6*out_c, HW)
        hcat = jnp.concatenate(
            [h[k * out_c:(k + 1) * out_c, :] for k in range(6)], axis=1)
        z = jnp.dot(hcat, ust, preferred_element_type=jnp.float32) + bias
        return jnp.maximum(z, 0.0)

    # ---- branches + time-upsample + mid conv (pre-BN), per batch sample ----
    ys = []
    for b in range(B):                                   # B is tiny & static
        z1 = branch(x1_ref[b], w1, b1)                   # (out_c, H2)
        z2 = branch(x2_ref[b], w2, b2)
        xcol = jnp.concatenate([z1, z2, x3_ref[b]], axis=0)   # (3*out_c, H2)
        hm = jnp.dot(wm, xcol, preferred_element_type=jnp.float32)
        hmcat = jnp.concatenate(
            [hm[k * out_c:(k + 1) * out_c, :] for k in range(3)], axis=1)
        ys.append(jnp.dot(hmcat, at, preferred_element_type=jnp.float32) + bm)

    # ---- BatchNorm2d: training-mode biased batch stats over (B, T, 1) ----
    cnt = float(B * T)
    tot = ys[0]
    for yb in ys[1:]:
        tot = tot + yb
    mean = jnp.sum(tot, axis=1, keepdims=True) / cnt                    # (out_c, 1)
    sq = jnp.square(ys[0] - mean)
    for yb in ys[1:]:
        sq = sq + jnp.square(yb - mean)
    var = jnp.sum(sq, axis=1, keepdims=True) / cnt
    scale = jax.lax.rsqrt(var + 1e-5) * gamma                           # (out_c, 1)

    # ---- BN affine + ReLU, out_conv + ReLU, direct (n_comp, T) store ----
    for b in range(B):
        yn = jnp.maximum((ys[b] - mean) * scale + beta, 0.0)            # (out_c, T)
        ho = jnp.dot(wo, yn, preferred_element_type=jnp.float32)        # (3*n_comp, T)
        hocat = jnp.concatenate(
            [ho[k * n_comp:(k + 1) * n_comp, :] for k in range(3)], axis=1)
        out = jnp.dot(hocat, dst, preferred_element_type=jnp.float32) + bo
        o_ref[b] = jnp.maximum(out, 0.0)


# ----------------------------------------------------------------------------
# Factory: builds (and hoists) all operators/weights once, returns jitted fwd.
# ----------------------------------------------------------------------------
def make_psi_forward(params, n_comp, T, x1_shape, x2_shape, x3_shape):
    B, C1, H, W = x1_shape
    B2, C2, Hb, Wb = x2_shape
    B3, C3, H3, W3 = x3_shape
    out_c = int(params['w1'].shape[0])
    assert C1 == params['w1'].shape[1] and C2 == params['w2'].shape[1]
    assert (H, W) == (Hb, Wb) and B == B2 == B3
    assert H3 == 2 * H and W3 == 2 * W + 1
    assert C3 == out_c and n_comp == params['wo'].shape[0]
    H2, W2, HW = 2 * H, 2 * W, H * W

    w1 = np.asarray(params['w1'], np.float32)
    w2 = np.asarray(params['w2'], np.float32)
    wm = np.asarray(params['wm'], np.float32)
    wo = np.asarray(params['wo'], np.float32)

    # Bilinear-2x rows producing width columns 0 / 1 of the upsampled map.
    Ah = interp_matrix(H, H2)                                   # (H2, H)
    Aw = interp_matrix(W, W2)                                   # (W2, W)
    Rcol = [np.kron(Ah, Aw[c:c + 1, :]) for c in (0, 1)]        # (H2, H*W)

    # Column-0 slice of the 3x3 'same' conv on the upsampled map: only taps
    # with dx in {1,2} survive (dx==0 samples the zero padding).
    u_blocks, w_taps = [], []
    for dy in range(3):
        for c in (0, 1):                       # c = dx - 1 = sampled up-column
            u_blocks.append(_shift_rows(Rcol[c], dy).T)         # (H*W, H2)
            w_taps.append((dy, c + 1))
    UstackT = np.concatenate(u_blocks, axis=0)                  # (6*H*W, H2)
    W1all = np.concatenate([w1[:, :, dy, dx] for dy, dx in w_taps], axis=0)
    W2all = np.concatenate([w2[:, :, dy, dx] for dy, dx in w_taps], axis=0)

    # Time upsample (H2 -> T, align_corners=True) with the 3 height taps of
    # the mid conv folded in (width-1 map only sees the kw==1 column).
    At = interp_matrix(H2, T)                                   # (T, H2)
    AtT_stack = np.concatenate([_shift_rows(At, dy).T for dy in range(3)],
                               axis=0)                          # (3*H2, T)
    Wm_all = np.concatenate([wm[:, :, dy, 1] for dy in range(3)], axis=0)

    # Post-BN out_conv: shifts cannot be folded through BN/ReLU -> one small
    # stacked 0/1 operator (identity block for dy == 1).
    Dstack = np.concatenate([_shift_rows(np.eye(T, dtype=np.float32), dy).T
                             for dy in range(3)], axis=0)       # (3*T, T)
    Wo_all = np.concatenate([wo[:, :, dy, 1] for dy in range(3)], axis=0)

    consts = tuple(jnp.asarray(a, jnp.float32) for a in (
        UstackT,
        W1all, np.asarray(params['b1']).reshape(out_c, 1),
        W2all, np.asarray(params['b2']).reshape(out_c, 1),
        Wm_all, np.asarray(params['bm']).reshape(out_c, 1),
        np.asarray(params['gamma']).reshape(out_c, 1),
        np.asarray(params['beta']).reshape(out_c, 1),
        AtT_stack,
        Wo_all, np.asarray(params['bo']).reshape(n_comp, 1),
        Dstack))

    mm = lambda m, k, n: 2 * m * k * n
    flops = B * (mm(6 * out_c, C1, HW) + mm(6 * out_c, C2, HW)
                 + 2 * mm(out_c, 6 * HW, H2)
                 + mm(3 * out_c, 3 * out_c, H2) + mm(out_c, 3 * H2, T)
                 + mm(3 * n_comp, out_c, T) + mm(n_comp, 3 * T, T))
    bytes_accessed = 4 * (B * (C1 + C2) * HW + B * C3 * H2 + B * n_comp * T
                          + sum(int(c.size) for c in consts))

    fused = pl.pallas_call(
        _psi_fused_kernel,
        out_shape=jax.ShapeDtypeStruct((B, n_comp, T), jnp.float32),
        cost_estimate=pl.CostEstimate(flops=int(flops),
                                      transcendentals=int(out_c),
                                      bytes_accessed=int(bytes_accessed)),
    )

    @jax.jit
    def forward(x1, x2, x3):
        # channels-on-sublanes / positions-on-lanes; reshapes are free.
        x1r = x1.reshape(B, C1, HW)
        x2r = x2.reshape(B, C2, HW)
        x3c = x3[:, :, :, 0]                    # (B, out_c, H2) width column 0
        return fused(x1r, x2r, x3c, *consts)

    return forward


# ----------------------------------------------------------------------------
# Pure-JAX reference for verification.
# ----------------------------------------------------------------------------
def reference_forward(inp, params, T):
    x1, x2, x3 = inp
    hp = jax.lax.Precision.HIGHEST

    def up2x(x):
        Bx, C, H, W = x.shape
        Ah = jnp.asarray(interp_matrix(H, 2 * H))
        Aw = jnp.asarray(interp_matrix(W, 2 * W))
        return jnp.einsum('ph,qw,bchw->bcpq', Ah, Aw, x, precision=hp)

    def conv_same(x, w, b):
        y = jax.lax.conv_general_dilated(
            x, w, window_strides=(1, 1), padding='SAME',
            dimension_numbers=('NCHW', 'OIHW', 'NCHW'), precision=hp)
        return y + b[None, :, None, None]

    relu = lambda v: jnp.maximum(v, 0.0)
    a = relu(conv_same(up2x(x1), params['w1'], params['b1']))
    c = relu(conv_same(up2x(x2), params['w2'], params['b2']))
    a = jnp.pad(a, ((0, 0), (0, 0), (0, 0), (0, 1)))
    c = jnp.pad(c, ((0, 0), (0, 0), (0, 0), (0, 1)))
    x = jnp.concatenate([a, c, x3], axis=1)
    H2 = x.shape[2]
    At = jnp.asarray(interp_matrix(H2, T))
    xt = jnp.einsum('th,bch->bct', At, x[:, :, :, 0], precision=hp)[..., None]
    y = conv_same(xt, params['wm'], params['bm'])
    mean = jnp.mean(y, axis=(0, 2, 3), keepdims=True)
    var = jnp.mean(jnp.square(y - mean), axis=(0, 2, 3), keepdims=True)
    y = (y - mean) * jax.lax.rsqrt(var + 1e-5)
    y = y * params['gamma'][None, :, None, None] + params['beta'][None, :, None, None]
    y = relu(y)
    z = relu(conv_same(y, params['wo'], params['bo']))
    return z[:, :, :, 0]


# ----------------------------------------------------------------------------
if __name__ == "__main__":
    n_comp, T = 16, 24
    in_emb_dims = [24, 16, 8]            # last (smallest) entry = out_c = 8
    B, H, W = 2, 6, 2                    # -> x3 spatial (2H, 2W+1) = (12, 5)

    key = jax.random.PRNGKey(0)
    k1, k2, k3, kp = jax.random.split(key, 4)
    x1 = jax.random.normal(k1, (B, in_emb_dims[0], H, W), jnp.float32)
    x2 = jax.random.normal(k2, (B, in_emb_dims[1], H, W), jnp.float32)
    x3 = jax.random.normal(k3, (B, in_emb_dims[2], 2 * H, 2 * W + 1), jnp.float32)
    params = init_params(kp, in_emb_dims, n_comp)

    psi = make_psi_forward(params, n_comp, T, x1.shape, x2.shape, x3.shape)
    out = jax.block_until_ready(psi(x1, x2, x3))
    assert out.shape == (B, n_comp, T), out.shape

    ref = reference_forward([x1, x2, x3], params, T=T)
    np.testing.assert_allclose(np.asarray(out), np.asarray(ref),
                               rtol=2e-2, atol=2e-2)
    print("KERNEL_OK")
</pallas_src>

<mosaic_0001>
module attributes {stable_mosaic.version = 11 : i64} {
  func.func @_psi_fused_kernel(%arg0: memref<2x24x12xf32, #tpu.memory_space<vmem>>, %arg1: memref<2x16x12xf32, #tpu.memory_space<vmem>>, %arg2: memref<2x8x12xf32, #tpu.memory_space<vmem>>, %arg3: memref<72x12xf32, #tpu.memory_space<vmem>>, %arg4: memref<48x24xf32, #tpu.memory_space<vmem>>, %arg5: memref<8x1xf32, #tpu.memory_space<vmem>>, %arg6: memref<48x16xf32, #tpu.memory_space<vmem>>, %arg7: memref<8x1xf32, #tpu.memory_space<vmem>>, %arg8: memref<24x24xf32, #tpu.memory_space<vmem>>, %arg9: memref<8x1xf32, #tpu.memory_space<vmem>>, %arg10: memref<8x1xf32, #tpu.memory_space<vmem>>, %arg11: memref<8x1xf32, #tpu.memory_space<vmem>>, %arg12: memref<36x24xf32, #tpu.memory_space<vmem>>, %arg13: memref<48x8xf32, #tpu.memory_space<vmem>>, %arg14: memref<16x1xf32, #tpu.memory_space<vmem>>, %arg15: memref<72x24xf32, #tpu.memory_space<vmem>>, %arg16: memref<2x16x24xf32, #tpu.memory_space<vmem>>) attributes {dimension_semantics = [], scalar_prefetch = 0 : i64, scratch_operands = 0 : i64, tpu.core_type = #tpu.core_type<tc>} {
    %c0 = arith.constant 0 : index
    %c0_0 = arith.constant 0 : index
    %0 = vector.load %arg3[%c0, %c0_0] : memref<72x12xf32, #tpu.memory_space<vmem>>, vector<72x12xf32>
    %c0_1 = arith.constant 0 : index
    %c0_2 = arith.constant 0 : index
    %1 = vector.load %arg12[%c0_1, %c0_2] : memref<36x24xf32, #tpu.memory_space<vmem>>, vector<36x24xf32>
    %c0_3 = arith.constant 0 : index
    %c0_4 = arith.constant 0 : index
    %2 = vector.load %arg15[%c0_3, %c0_4] : memref<72x24xf32, #tpu.memory_space<vmem>>, vector<72x24xf32>
    %c0_5 = arith.constant 0 : index
    %c0_6 = arith.constant 0 : index
    %3 = vector.load %arg4[%c0_5, %c0_6] : memref<48x24xf32, #tpu.memory_space<vmem>>, vector<48x24xf32>
    %c0_7 = arith.constant 0 : index
    %c0_8 = arith.constant 0 : index
    %4 = vector.load %arg6[%c0_7, %c0_8] : memref<48x16xf32, #tpu.memory_space<vmem>>, vector<48x16xf32>
    %c0_9 = arith.constant 0 : index
    %c0_10 = arith.constant 0 : index
    %5 = vector.load %arg8[%c0_9, %c0_10] : memref<24x24xf32, #tpu.memory_space<vmem>>, vector<24x24xf32>
    %c0_11 = arith.constant 0 : index
    %c0_12 = arith.constant 0 : index
    %6 = vector.load %arg13[%c0_11, %c0_12] : memref<48x8xf32, #tpu.memory_space<vmem>>, vector<48x8xf32>
    %c0_13 = arith.constant 0 : index
    %c0_14 = arith.constant 0 : index
    %7 = vector.load %arg5[%c0_13, %c0_14] : memref<8x1xf32, #tpu.memory_space<vmem>>, vector<8x1xf32>
    %c0_15 = arith.constant 0 : index
    %c0_16 = arith.constant 0 : index
    %8 = vector.load %arg7[%c0_15, %c0_16] : memref<8x1xf32, #tpu.memory_space<vmem>>, vector<8x1xf32>
    %c0_17 = arith.constant 0 : index
    %c0_18 = arith.constant 0 : index
    %9 = vector.load %arg9[%c0_17, %c0_18] : memref<8x1xf32, #tpu.memory_space<vmem>>, vector<8x1xf32>
    %c0_19 = arith.constant 0 : index
    %c0_20 = arith.constant 0 : index
    %10 = vector.load %arg10[%c0_19, %c0_20] : memref<8x1xf32, #tpu.memory_space<vmem>>, vector<8x1xf32>
    %c0_21 = arith.constant 0 : index
    %c0_22 = arith.constant 0 : index
    %11 = vector.load %arg11[%c0_21, %c0_22] : memref<8x1xf32, #tpu.memory_space<vmem>>, vector<8x1xf32>
    %c0_23 = arith.constant 0 : index
    %c0_24 = arith.constant 0 : index
    %12 = vector.load %arg14[%c0_23, %c0_24] : memref<16x1xf32, #tpu.memory_space<vmem>>, vector<16x1xf32>
    %c0_25 = arith.constant 0 : index
    %c0_26 = arith.constant 0 : index
    %c0_27 = arith.constant 0 : index
    %13 = vector.load %arg0[%c0_25, %c0_26, %c0_27] : memref<2x24x12xf32, #tpu.memory_space<vmem>>, vector<1x24x12xf32>
    %14 = vector.shape_cast %13 : vector<1x24x12xf32> to vector<24x12xf32>
    %cst = arith.constant dense<0.000000e+00> : vector<48x12xf32>
    %15 = tpu.matmul %3, %14, %cst {dimension_numbers = #tpu.dot_dimension_numbers<[1], [0], [0], [1], [0, 0, 1, 1], [], []>} : vector<48x24xf32>, vector<24x12xf32>, vector<48x12xf32> -> vector<48x12xf32>
    %16 = vector.extract_strided_slice %15 {offsets = [0, 0], sizes = [8, 12], strides = [1, 1]} : vector<48x12xf32> to vector<8x12xf32>
    %17 = vector.extract_strided_slice %15 {offsets = [8, 0], sizes = [8, 12], strides = [1, 1]} : vector<48x12xf32> to vector<8x12xf32>
    %18 = vector.extract_strided_slice %15 {offsets = [16, 0], sizes = [8, 12], strides = [1, 1]} : vector<48x12xf32> to vector<8x12xf32>
    %19 = vector.extract_strided_slice %15 {offsets = [24, 0], sizes = [8, 12], strides = [1, 1]} : vector<48x12xf32> to vector<8x12xf32>
    %20 = vector.extract_strided_slice %15 {offsets = [32, 0], sizes = [8, 12], strides = [1, 1]} : vector<48x12xf32> to vector<8x12xf32>
    %21 = vector.extract_strided_slice %15 {offsets = [40, 0], sizes = [8, 12], strides = [1, 1]} : vector<48x12xf32> to vector<8x12xf32>
    %22 = tpu.concatenate %16, %17, %18, %19, %20, %21 in 1 : vector<8x12xf32>, vector<8x12xf32>, vector<8x12xf32>, vector<8x12xf32>, vector<8x12xf32>, vector<8x12xf32> -> vector<8x72xf32>
    %cst_28 = arith.constant dense<0.000000e+00> : vector<8x12xf32>
    %23 = tpu.matmul %22, %0, %cst_28 {dimension_numbers = #tpu.dot_dimension_numbers<[1], [0], [0], [1], [0, 0, 1, 1], [], []>} : vector<8x72xf32>, vector<72x12xf32>, vector<8x12xf32> -> vector<8x12xf32>
    %24 = vector.broadcast %7 : vector<8x1xf32> to vector<8x12xf32>
    %25 = arith.addf %23, %24 : vector<8x12xf32>
    %cst_29 = arith.constant 0.000000e+00 : f32
    %26 = vector.broadcast %cst_29 : f32 to vector<8x12xf32>
    %27 = arith.maximumf %25, %26 : vector<8x12xf32>
    %c0_30 = arith.constant 0 : index
    %c0_31 = arith.constant 0 : index
    %c0_32 = arith.constant 0 : index
    %28 = vector.load %arg1[%c0_30, %c0_31, %c0_32] : memref<2x16x12xf32, #tpu.memory_space<vmem>>, vector<1x16x12xf32>
    %29 = vector.shape_cast %28 : vector<1x16x12xf32> to vector<16x12xf32>
    %cst_33 = arith.constant dense<0.000000e+00> : vector<48x12xf32>
    %30 = tpu.matmul %4, %29, %cst_33 {dimension_numbers = #tpu.dot_dimension_numbers<[1], [0], [0], [1], [0, 0, 1, 1], [], []>} : vector<48x16xf32>, vector<16x12xf32>, vector<48x12xf32> -> vector<48x12xf32>
    %31 = vector.extract_strided_slice %30 {offsets = [0, 0], sizes = [8, 12], strides = [1, 1]} : vector<48x12xf32> to vector<8x12xf32>
    %32 = vector.extract_strided_slice %30 {offsets = [8, 0], sizes = [8, 12], strides = [1, 1]} : vector<48x12xf32> to vector<8x12xf32>
    %33 = vector.extract_strided_slice %30 {offsets = [16, 0], sizes = [8, 12], strides = [1, 1]} : vector<48x12xf32> to vector<8x12xf32>
    %34 = vector.extract_strided_slice %30 {offsets = [24, 0], sizes = [8, 12], strides = [1, 1]} : vector<48x12xf32> to vector<8x12xf32>
    %35 = vector.extract_strided_slice %30 {offsets = [32, 0], sizes = [8, 12], strides = [1, 1]} : vector<48x12xf32> to vector<8x12xf32>
    %36 = vector.extract_strided_slice %30 {offsets = [40, 0], sizes = [8, 12], strides = [1, 1]} : vector<48x12xf32> to vector<8x12xf32>
    %37 = tpu.concatenate %31, %32, %33, %34, %35, %36 in 1 : vector<8x12xf32>, vector<8x12xf32>, vector<8x12xf32>, vector<8x12xf32>, vector<8x12xf32>, vector<8x12xf32> -> vector<8x72xf32>
    %cst_34 = arith.constant dense<0.000000e+00> : vector<8x12xf32>
    %38 = tpu.matmul %37, %0, %cst_34 {dimension_numbers = #tpu.dot_dimension_numbers<[1], [0], [0], [1], [0, 0, 1, 1], [], []>} : vector<8x72xf32>, vector<72x12xf32>, vector<8x12xf32> -> vector<8x12xf32>
    %39 = vector.broadcast %8 : vector<8x1xf32> to vector<8x12xf32>
    %40 = arith.addf %38, %39 : vector<8x12xf32>
    %cst_35 = arith.constant 0.000000e+00 : f32
    %41 = vector.broadcast %cst_35 : f32 to vector<8x12xf32>
    %42 = arith.maximumf %40, %41 : vector<8x12xf32>
    %c0_36 = arith.constant 0 : index
    %c0_37 = arith.constant 0 : index
    %c0_38 = arith.constant 0 : index
    %43 = vector.load %arg2[%c0_36, %c0_37, %c0_38] : memref<2x8x12xf32, #tpu.memory_space<vmem>>, vector<1x8x12xf32>
    %44 = vector.shape_cast %43 : vector<1x8x12xf32> to vector<8x12xf32>
    %45 = tpu.concatenate %27, %42, %44 in 0 : vector<8x12xf32>, vector<8x12xf32>, vector<8x12xf32> -> vector<24x12xf32>
    %cst_39 = arith.constant dense<0.000000e+00> : vector<24x12xf32>
    %46 = tpu.matmul %5, %45, %cst_39 {dimension_numbers = #tpu.dot_dimension_numbers<[1], [0], [0], [1], [0, 0, 1, 1], [], []>} : vector<24x24xf32>, vector<24x12xf32>, vector<24x12xf32> -> vector<24x12xf32>
    %47 = vector.extract_strided_slice %46 {offsets = [0, 0], sizes = [8, 12], strides = [1, 1]} : vector<24x12xf32> to vector<8x12xf32>
    %48 = vector.extract_strided_slice %46 {offsets = [8, 0], sizes = [8, 12], strides = [1, 1]} : vector<24x12xf32> to vector<8x12xf32>
    %49 = vector.extract_strided_slice %46 {offsets = [16, 0], sizes = [8, 12], strides = [1, 1]} : vector<24x12xf32> to vector<8x12xf32>
    %50 = tpu.concatenate %47, %48, %49 in 1 : vector<8x12xf32>, vector<8x12xf32>, vector<8x12xf32> -> vector<8x36xf32>
    %cst_40 = arith.constant dense<0.000000e+00> : vector<8x24xf32>
    %51 = tpu.matmul %50, %1, %cst_40 {dimension_numbers = #tpu.dot_dimension_numbers<[1], [0], [0], [1], [0, 0, 1, 1], [], []>} : vector<8x36xf32>, vector<36x24xf32>, vector<8x24xf32> -> vector<8x24xf32>
    %52 = vector.broadcast %9 : vector<8x1xf32> to vector<8x24xf32>
    %53 = arith.addf %51, %52 : vector<8x24xf32>
    %c1 = arith.constant 1 : index
    %c0_41 = arith.constant 0 : index
    %c0_42 = arith.constant 0 : index
    %54 = vector.load %arg0[%c1, %c0_41, %c0_42] : memref<2x24x12xf32, #tpu.memory_space<vmem>>, vector<1x24x12xf32>
    %55 = vector.shape_cast %54 : vector<1x24x12xf32> to vector<24x12xf32>
    %cst_43 = arith.constant dense<0.000000e+00> : vector<48x12xf32>
    %56 = tpu.matmul %3, %55, %cst_43 {dimension_numbers = #tpu.dot_dimension_numbers<[1], [0], [0], [1], [0, 0, 1, 1], [], []>} : vector<48x24xf32>, vector<24x12xf32>, vector<48x12xf32> -> vector<48x12xf32>
    %57 = vector.extract_strided_slice %56 {offsets = [0, 0], sizes = [8, 12], strides = [1, 1]} : vector<48x12xf32> to vector<8x12xf32>
    %58 = vector.extract_strided_slice %56 {offsets = [8, 0], sizes = [8, 12], strides = [1, 1]} : vector<48x12xf32> to vector<8x12xf32>
    %59 = vector.extract_strided_slice %56 {offsets = [16, 0], sizes = [8, 12], strides = [1, 1]} : vector<48x12xf32> to vector<8x12xf32>
    %60 = vector.extract_strided_slice %56 {offsets = [24, 0], sizes = [8, 12], strides = [1, 1]} : vector<48x12xf32> to vector<8x12xf32>
    %61 = vector.extract_strided_slice %56 {offsets = [32, 0], sizes = [8, 12], strides = [1, 1]} : vector<48x12xf32> to vector<8x12xf32>
    %62 = vector.extract_strided_slice %56 {offsets = [40, 0], sizes = [8, 12], strides = [1, 1]} : vector<48x12xf32> to vector<8x12xf32>
    %63 = tpu.concatenate %57, %58, %59, %60, %61, %62 in 1 : vector<8x12xf32>, vector<8x12xf32>, vector<8x12xf32>, vector<8x12xf32>, vector<8x12xf32>, vector<8x12xf32> -> vector<8x72xf32>
    %cst_44 = arith.constant dense<0.000000e+00> : vector<8x12xf32>
    %64 = tpu.matmul %63, %0, %cst_44 {dimension_numbers = #tpu.dot_dimension_numbers<[1], [0], [0], [1], [0, 0, 1, 1], [], []>} : vector<8x72xf32>, vector<72x12xf32>, vector<8x12xf32> -> vector<8x12xf32>
    %65 = vector.broadcast %7 : vector<8x1xf32> to vector<8x12xf32>
    %66 = arith.addf %64, %65 : vector<8x12xf32>
    %cst_45 = arith.constant 0.000000e+00 : f32
    %67 = vector.broadcast %cst_45 : f32 to vector<8x12xf32>
    %68 = arith.maximumf %66, %67 : vector<8x12xf32>
    %c1_46 = arith.constant 1 : index
    %c0_47 = arith.constant 0 : index
    %c0_48 = arith.constant 0 : index
    %69 = vector.load %arg1[%c1_46, %c0_47, %c0_48] : memref<2x16x12xf32, #tpu.memory_space<vmem>>, vector<1x16x12xf32>
    %70 = vector.shape_cast %69 : vector<1x16x12xf32> to vector<16x12xf32>
    %cst_49 = arith.constant dense<0.000000e+00> : vector<48x12xf32>
    %71 = tpu.matmul %4, %70, %cst_49 {dimension_numbers = #tpu.dot_dimension_numbers<[1], [0], [0], [1], [0, 0, 1, 1], [], []>} : vector<48x16xf32>, vector<16x12xf32>, vector<48x12xf32> -> vector<48x12xf32>
    %72 = vector.extract_strided_slice %71 {offsets = [0, 0], sizes = [8, 12], strides = [1, 1]} : vector<48x12xf32> to vector<8x12xf32>
    %73 = vector.extract_strided_slice %71 {offsets = [8, 0], sizes = [8, 12], strides = [1, 1]} : vector<48x12xf32> to vector<8x12xf32>
    %74 = vector.extract_strided_slice %71 {offsets = [16, 0], sizes = [8, 12], strides = [1, 1]} : vector<48x12xf32> to vector<8x12xf32>
    %75 = vector.extract_strided_slice %71 {offsets = [24, 0], sizes = [8, 12], strides = [1, 1]} : vector<48x12xf32> to vector<8x12xf32>
    %76 = vector.extract_strided_slice %71 {offsets = [32, 0], sizes = [8, 12], strides = [1, 1]} : vector<48x12xf32> to vector<8x12xf32>
    %77 = vector.extract_strided_slice %71 {offsets = [40, 0], sizes = [8, 12], strides = [1, 1]} : vector<48x12xf32> to vector<8x12xf32>
    %78 = tpu.concatenate %72, %73, %74, %75, %76, %77 in 1 : vector<8x12xf32>, vector<8x12xf32>, vector<8x12xf32>, vector<8x12xf32>, vector<8x12xf32>, vector<8x12xf32> -> vector<8x72xf32>
    %cst_50 = arith.constant dense<0.000000e+00> : vector<8x12xf32>
    %79 = tpu.matmul %78, %0, %cst_50 {dimension_numbers = #tpu.dot_dimension_numbers<[1], [0], [0], [1], [0, 0, 1, 1], [], []>} : vector<8x72xf32>, vector<72x12xf32>, vector<8x12xf32> -> vector<8x12xf32>
    %80 = vector.broadcast %8 : vector<8x1xf32> to vector<8x12xf32>
    %81 = arith.addf %79, %80 : vector<8x12xf32>
    %cst_51 = arith.constant 0.000000e+00 : f32
    %82 = vector.broadcast %cst_51 : f32 to vector<8x12xf32>
    %83 = arith.maximumf %81, %82 : vector<8x12xf32>
    %c1_52 = arith.constant 1 : index
    %c0_53 = arith.constant 0 : index
    %c0_54 = arith.constant 0 : index
    %84 = vector.load %arg2[%c1_52, %c0_53, %c0_54] : memref<2x8x12xf32, #tpu.memory_space<vmem>>, vector<1x8x12xf32>
    %85 = vector.shape_cast %84 : vector<1x8x12xf32> to vector<8x12xf32>
    %86 = tpu.concatenate %68, %83, %85 in 0 : vector<8x12xf32>, vector<8x12xf32>, vector<8x12xf32> -> vector<24x12xf32>
    %cst_55 = arith.constant dense<0.000000e+00> : vector<24x12xf32>
    %87 = tpu.matmul %5, %86, %cst_55 {dimension_numbers = #tpu.dot_dimension_numbers<[1], [0], [0], [1], [0, 0, 1, 1], [], []>} : vector<24x24xf32>, vector<24x12xf32>, vector<24x12xf32> -> vector<24x12xf32>
    %88 = vector.extract_strided_slice %87 {offsets = [0, 0], sizes = [8, 12], strides = [1, 1]} : vector<24x12xf32> to vector<8x12xf32>
    %89 = vector.extract_strided_slice %87 {offsets = [8, 0], sizes = [8, 12], strides = [1, 1]} : vector<24x12xf32> to vector<8x12xf32>
    %90 = vector.extract_strided_slice %87 {offsets = [16, 0], sizes = [8, 12], strides = [1, 1]} : vector<24x12xf32> to vector<8x12xf32>
    %91 = tpu.concatenate %88, %89, %90 in 1 : vector<8x12xf32>, vector<8x12xf32>, vector<8x12xf32> -> vector<8x36xf32>
    %cst_56 = arith.constant dense<0.000000e+00> : vector<8x24xf32>
    %92 = tpu.matmul %91, %1, %cst_56 {dimension_numbers = #tpu.dot_dimension_numbers<[1], [0], [0], [1], [0, 0, 1, 1], [], []>} : vector<8x36xf32>, vector<36x24xf32>, vector<8x24xf32> -> vector<8x24xf32>
    %93 = vector.broadcast %9 : vector<8x1xf32> to vector<8x24xf32>
    %94 = arith.addf %92, %93 : vector<8x24xf32>
    %95 = arith.addf %53, %94 : vector<8x24xf32>
    %cst_57 = arith.constant dense<0.000000e+00> : vector<8xf32>
    %96 = vector.multi_reduction <add>, %95, %cst_57 [1] : vector<8x24xf32> to vector<8xf32>
    %97 = vector.shape_cast %96 : vector<8xf32> to vector<8x1xf32>
    %cst_58 = arith.constant 4.800000e+01 : f32
    %98 = vector.broadcast %cst_58 : f32 to vector<8x1xf32>
    %99 = arith.divf %97, %98 : vector<8x1xf32>
    %100 = vector.broadcast %99 : vector<8x1xf32> to vector<8x24xf32>
    %101 = arith.subf %53, %100 : vector<8x24xf32>
    %102 = arith.mulf %101, %101 : vector<8x24xf32>
    %103 = vector.broadcast %99 : vector<8x1xf32> to vector<8x24xf32>
    %104 = arith.subf %94, %103 : vector<8x24xf32>
    %105 = arith.mulf %104, %104 : vector<8x24xf32>
    %106 = arith.addf %102, %105 : vector<8x24xf32>
    %cst_59 = arith.constant dense<0.000000e+00> : vector<8xf32>
    %107 = vector.multi_reduction <add>, %106, %cst_59 [1] : vector<8x24xf32> to vector<8xf32>
    %108 = vector.shape_cast %107 : vector<8xf32> to vector<8x1xf32>
    %cst_60 = arith.constant 4.800000e+01 : f32
    %109 = vector.broadcast %cst_60 : f32 to vector<8x1xf32>
    %110 = arith.divf %108, %109 : vector<8x1xf32>
    %cst_61 = arith.constant 9.99999974E-6 : f32
    %111 = vector.broadcast %cst_61 : f32 to vector<8x1xf32>
    %112 = arith.addf %110, %111 : vector<8x1xf32>
    %113 = math.rsqrt %112 : vector<8x1xf32>
    %114 = arith.mulf %113, %10 : vector<8x1xf32>
    %115 = vector.broadcast %99 : vector<8x1xf32> to vector<8x24xf32>
    %116 = arith.subf %53, %115 : vector<8x24xf32>
    %117 = vector.broadcast %114 : vector<8x1xf32> to vector<8x24xf32>
    %118 = arith.mulf %116, %117 : vector<8x24xf32>
    %119 = vector.broadcast %11 : vector<8x1xf32> to vector<8x24xf32>
    %120 = arith.addf %118, %119 : vector<8x24xf32>
    %cst_62 = arith.constant 0.000000e+00 : f32
    %121 = vector.broadcast %cst_62 : f32 to vector<8x24xf32>
    %122 = arith.maximumf %120, %121 : vector<8x24xf32>
    %cst_63 = arith.constant dense<0.000000e+00> : vector<48x24xf32>
    %123 = tpu.matmul %6, %122, %cst_63 {dimension_numbers = #tpu.dot_dimension_numbers<[1], [0], [0], [1], [0, 0, 1, 1], [], []>} : vector<48x8xf32>, vector<8x24xf32>, vector<48x24xf32> -> vector<48x24xf32>
    %124 = vector.extract_strided_slice %123 {offsets = [0, 0], sizes = [16, 24], strides = [1, 1]} : vector<48x24xf32> to vector<16x24xf32>
    %125 = vector.extract_strided_slice %123 {offsets = [16, 0], sizes = [16, 24], strides = [1, 1]} : vector<48x24xf32> to vector<16x24xf32>
    %126 = vector.extract_strided_slice %123 {offsets = [32, 0], sizes = [16, 24], strides = [1, 1]} : vector<48x24xf32> to vector<16x24xf32>
    %127 = tpu.concatenate %124, %125, %126 in 1 : vector<16x24xf32>, vector<16x24xf32>, vector<16x24xf32> -> vector<16x72xf32>
    %cst_64 = arith.constant dense<0.000000e+00> : vector<16x24xf32>
    %128 = tpu.matmul %127, %2, %cst_64 {dimension_numbers = #tpu.dot_dimension_numbers<[1], [0], [0], [1], [0, 0, 1, 1], [], []>} : vector<16x72xf32>, vector<72x24xf32>, vector<16x24xf32> -> vector<16x24xf32>
    %129 = vector.broadcast %12 : vector<16x1xf32> to vector<16x24xf32>
    %130 = arith.addf %128, %129 : vector<16x24xf32>
    %cst_65 = arith.constant 0.000000e+00 : f32
    %131 = vector.broadcast %cst_65 : f32 to vector<16x24xf32>
    %132 = arith.maximumf %130, %131 : vector<16x24xf32>
    %c0_66 = arith.constant 0 : index
    %c0_67 = arith.constant 0 : index
    %c0_68 = arith.constant 0 : index
    %133 = vector.load %arg16[%c0_66, %c0_67, %c0_68] : memref<2x16x24xf32, #tpu.memory_space<vmem>>, vector<1x16x24xf32>
    %134 = vector.shape_cast %133 : vector<1x16x24xf32> to vector<16x24xf32>
    %135 = vector.shape_cast %132 : vector<16x24xf32> to vector<1x16x24xf32>
    tpu.vector_store %arg16[%c0_66, %c0_67, %c0_68], %135 {strides = array<i32>} : memref<2x16x24xf32, #tpu.memory_space<vmem>>, vector<1x16x24xf32>,
    %136 = vector.broadcast %99 : vector<8x1xf32> to vector<8x24xf32>
    %137 = arith.subf %94, %136 : vector<8x24xf32>
    %138 = vector.broadcast %114 : vector<8x1xf32> to vector<8x24xf32>
    %139 = arith.mulf %137, %138 : vector<8x24xf32>
    %140 = vector.broadcast %11 : vector<8x1xf32> to vector<8x24xf32>
    %141 = arith.addf %139, %140 : vector<8x24xf32>
    %cst_69 = arith.constant 0.000000e+00 : f32
    %142 = vector.broadcast %cst_69 : f32 to vector<8x24xf32>
    %143 = arith.maximumf %141, %142 : vector<8x24xf32>
    %cst_70 = arith.constant dense<0.000000e+00> : vector<48x24xf32>
    %144 = tpu.matmul %6, %143, %cst_70 {dimension_numbers = #tpu.dot_dimension_numbers<[1], [0], [0], [1], [0, 0, 1, 1], [], []>} : vector<48x8xf32>, vector<8x24xf32>, vector<48x24xf32> -> vector<48x24xf32>
    %145 = vector.extract_strided_slice %144 {offsets = [0, 0], sizes = [16, 24], strides = [1, 1]} : vector<48x24xf32> to vector<16x24xf32>
    %146 = vector.extract_strided_slice %144 {offsets = [16, 0], sizes = [16, 24], strides = [1, 1]} : vector<48x24xf32> to vector<16x24xf32>
    %147 = vector.extract_strided_slice %144 {offsets = [32, 0], sizes = [16, 24], strides = [1, 1]} : vector<48x24xf32> to vector<16x24xf32>
    %148 = tpu.concatenate %145, %146, %147 in 1 : vector<16x24xf32>, vector<16x24xf32>, vector<16x24xf32> -> vector<16x72xf32>
    %cst_71 = arith.constant dense<0.000000e+00> : vector<16x24xf32>
    %149 = tpu.matmul %148, %2, %cst_71 {dimension_numbers = #tpu.dot_dimension_numbers<[1], [0], [0], [1], [0, 0, 1, 1], [], []>} : vector<16x72xf32>, vector<72x24xf32>, vector<16x24xf32> -> vector<16x24xf32>
    %150 = vector.broadcast %12 : vector<16x1xf32> to vector<16x24xf32>
    %151 = arith.addf %149, %150 : vector<16x24xf32>
    %cst_72 = arith.constant 0.000000e+00 : f32
    %152 = vector.broadcast %cst_72 : f32 to vector<16x24xf32>
    %153 = arith.maximumf %151, %152 : vector<16x24xf32>
    %c1_73 = arith.constant 1 : index
    %c0_74 = arith.constant 0 : index
    %c0_75 = arith.constant 0 : index
    %154 = vector.load %arg16[%c1_73, %c0_74, %c0_75] : memref<2x16x24xf32, #tpu.memory_space<vmem>>, vector<1x16x24xf32>
    %155 = vector.shape_cast %154 : vector<1x16x24xf32> to vector<16x24xf32>
    %156 = vector.shape_cast %153 : vector<16x24xf32> to vector<1x16x24xf32>
    tpu.vector_store %arg16[%c1_73, %c0_74, %c0_75], %156 {strides = array<i32>} : memref<2x16x24xf32, #tpu.memory_space<vmem>>, vector<1x16x24xf32>,
    return
  }
}

</mosaic_0001>

<bundles_post_ra>
// kernel: forward.1
= control target key start
LH: loop header
LB: loop body
LE: loop exit
PB: predicated region body
PF: predicated region fallthrough
CT: control target
= control target key end

     0   :  { %s3111_s0 = inlined_call_operand.vmem [shape: f32[2,24,12], index: 0, kind: input, shape index: {}]   ;;  %s3112_s1 = inlined_call_operand.vmem [shape: f32[2,16,12], index: 1, kind: input, shape index: {}]   ;;  %s3113_s2 = inlined_call_operand.vmem [shape: f32[2,8,12], index: 2, kind: input, shape index: {}]   ;;  %s3114_s3 = inlined_call_operand.vmem [shape: f32[72,12], index: 3, kind: input, shape index: {}]   ;;  %s3115_s4 = inlined_call_operand.vmem [shape: f32[48,24], index: 4, kind: input, shape index: {}]   ;;  %s3116_s5 = inlined_call_operand.hbm [shape: f32[8,1], index: 5, kind: input, shape index: {}]   ;;  %s3117_s6 = inlined_call_operand.vmem [shape: f32[48,16], index: 6, kind: input, shape index: {}]   ;;  %s3118_s7 = inlined_call_operand.hbm [shape: f32[8,1], index: 7, kind: input, shape index: {}]   ;;  %s3119_s8 = inlined_call_operand.hbm [shape: f32[24,24], index: 8, kind: input, shape index: {}]   ;;  %s3120_s9 = inlined_call_operand.hbm [shape: f32[8,1], index: 9, kind: input, shape index: {}]   ;;  %s3121_s10 = inlined_call_operand.vmem [shape: f32[8,1], index: 10, kind: input, shape index: {}]   ;;  %s3122_s11 = inlined_call_operand.vmem [shape: f32[8,1], index: 11, kind: input, shape index: {}]   ;;  %s3123_s12 = inlined_call_operand.hbm [shape: f32[36,24], index: 12, kind: input, shape index: {}]   ;;  %s3124_s13 = inlined_call_operand.vmem [shape: f32[48,8], index: 13, kind: input, shape index: {}]   ;;  %s3125_s14 = inlined_call_operand.hbm [shape: f32[16,1], index: 14, kind: input, shape index: {}]   ;;  %s3126_s15 = inlined_call_operand.vmem [shape: f32[72,24], index: 15, kind: input, shape index: {}]   ;;  %s3127_s16 = inlined_call_operand.hbm [shape: f32[2,16,24], index: 16, kind: output, shape index: {}]  }
   0x1   :  { %3129 = sst [smem:[#allocation19_spill]] %s3111_s0 }
   0x2   :  { %21 = vsyncpa [#allocation3], 0 }
   0x3   :  { %22 = vsyncpa [#allocation6], 0 }
   0x4   :  { %23 = vsyncpa [#allocation9], 0 }
   0x5   :  { %24 = vsyncpa [#allocation12], 0 }
   0x6   :  { %25 = vsyncpa [#allocation4], 0  ;;  %s2478_s21 = smov [#allocation5]   ;;  %s2479_s23 = smov [#allocation8]  }
   0x7   :  { %s54_s22 = sshll.u32 %s2478_s21, 4  ;;  %s76_s24 = sshll.u32 %s2479_s23, 4  ;;  %s55_s22 = int_to_ptr.vmem [resolvable:$true] %s54_s22  ;;  %s77_s24 = int_to_ptr.vmem [resolvable:$true] %s76_s24 }
   0x8   :  { %s2336_s25 = scalar_lea.vmem %s55_s22, 128  ;;  %p2341_p1 = scmp.lt.s32.totalorder %s55_s22, %s55_s22 }
   0x9   :  { %p2337_p0 = scmp.ne.s32.totalorder %s55_s22, %s2336_s25  ;;  %p2342_p2 = scmp.lt.s32.totalorder %s2336_s25, %s2336_s25 }
   0xb   :  { %p2343_p3 = por %p2342_p2, %p2341_p1 }
   0xd   :  { %p2344_p4 = pnand %p2343_p3, %p2337_p0 }
   0xf   :  { %2347 = shalt.err (!%p2344_p4)
}
  0x10   :  { %57 = dma.hbm_to_vmem [thread:$0]  %s3118_s7, 128, %s55_s22, [#allocation6]  }
  0x11   :  { %s2356_s28 = scalar_lea.vmem %s77_s24, 128  ;;  %p2361_p6 = scmp.lt.s32.totalorder %s77_s24, %s77_s24 }
  0x12   :  { %p2357_p5 = scmp.ne.s32.totalorder %s77_s24, %s2356_s28  ;;  %p2362_p7 = scmp.lt.s32.totalorder %s2356_s28, %s2356_s28 }
  0x14   :  { %p2363_p8 = por %p2362_p7, %p2361_p6 }
  0x16   :  { %p2364_p9 = pnand %p2363_p8, %p2357_p5 }
  0x18   :  { %2367 = shalt.err (!%p2364_p9)
}
  0x19   :  { %79 = dma.hbm_to_vmem [thread:$0]  %s3120_s9, 128, %s77_s24, [#allocation9]  }
  0x1a   :  { %s2480_s0 = smov [#allocation2]   ;;  %s2481_s18 = smov [#allocation7]  }
  0x1b   :  { %s42_s17 = sshll.u32 %s2480_s0, 4  ;;  %s63_s19 = sshll.u32 %s2481_s18, 4  ;;  %s43_s17 = int_to_ptr.vmem [resolvable:$true] %s42_s17  ;;  %s64_s19 = int_to_ptr.vmem [resolvable:$true] %s63_s19 }
  0x1c   :  { %s2376_s20 = scalar_lea.vmem %s43_s17, 128  ;;  %p2381_p11 = scmp.lt.s32.totalorder %s43_s17, %s43_s17 }
  0x1d   :  { %p2377_p10 = scmp.ne.s32.totalorder %s43_s17, %s2376_s20  ;;  %p2382_p12 = scmp.lt.s32.totalorder %s2376_s20, %s2376_s20 }
  0x1f   :  { %p2383_p13 = por %p2382_p12, %p2381_p11 }
  0x21   :  { %p2384_p0 = pnand %p2383_p13, %p2377_p10 }
  0x23   :  { %2387 = shalt.err (!%p2384_p0)
}
  0x24   :  { %45 = dma.hbm_to_vmem [thread:$0]  %s3116_s5, 128, %s43_s17, [#allocation3]  }
  0x25   :  { %s2396_s22 = scalar_lea.vmem %s64_s19, 384  ;;  %p2401_p2 = scmp.lt.s32.totalorder %s64_s19, %s64_s19 }
  0x26   :  { %p2397_p1 = scmp.ne.s32.totalorder %s64_s19, %s2396_s22  ;;  %p2402_p3 = scmp.lt.s32.totalorder %s2396_s22, %s2396_s22 }
  0x28   :  { %p2403_p4 = por %p2402_p3, %p2401_p2 }
  0x2a   :  { %p2404_p5 = pnand %p2403_p4, %p2397_p1 }
  0x2c   :  { %2407 = shalt.err (!%p2404_p5)
}
  0x2d   :  { %s2482_s9 = smov 128   ;;  %s2483_s23 = smov 8  }
  0x2e   :  { %69 = dma.hbm_to_vmem [thread:$0]  %s3119_s8, 384, %s64_s19, [#allocation6], %s2482_s9, %s2482_s9, %s2483_s23  }
  0x2f   :  { %s2484_s26 = smov [#allocation10]   ;;  %s2485_s28 = smov [#allocation11]  }
  0x30   :  { %s89_s27 = sshll.u32 %s2484_s26, 4  ;;  %s103_s5 = sshll.u32 %s2485_s28, 4  ;;  %s90_s27 = int_to_ptr.vmem [resolvable:$true] %s89_s27  ;;  %s104_s5 = int_to_ptr.vmem [resolvable:$true] %s103_s5 }
  0x31   :  { %s2416_s29 = scalar_lea.vmem %s90_s27, 640  ;;  %p2421_p7 = scmp.lt.s32.totalorder %s90_s27, %s90_s27 }
  0x32   :  { %p2417_p6 = scmp.ne.s32.totalorder %s90_s27, %s2416_s29  ;;  %p2422_p8 = scmp.lt.s32.totalorder %s2416_s29, %s2416_s29 }
  0x34   :  { %p2423_p9 = por %p2422_p8, %p2421_p7 }
  0x36   :  { %p2424_p10 = pnand %p2423_p9, %p2417_p6 }
  0x38   :  { %2427 = shalt.err (!%p2424_p10)
}
  0x39   :  { %95 = dma.hbm_to_vmem [thread:$0]  %s3123_s12, 640, %s90_s27, [#allocation9], %s2482_s9, %s2482_s9, %s2483_s23  }
  0x3a   :  { %s2436_s8 = scalar_lea.vmem %s104_s5, 256  ;;  %p2441_p12 = scmp.lt.s32.totalorder %s104_s5, %s104_s5 }
  0x3b   :  { %p2437_p11 = scmp.ne.s32.totalorder %s104_s5, %s2436_s8  ;;  %p2442_p13 = scmp.lt.s32.totalorder %s2436_s8, %s2436_s8 }
  0x3d   :  { %p2443_p0 = por %p2442_p13, %p2441_p12 }
  0x3f   :  { %p2444_p1 = pnand %p2443_p0, %p2437_p11 }
  0x41   :  { %2447 = shalt.err (!%p2444_p1)
}
  0x42   :  { %109 = dma.hbm_to_vmem [thread:$0]  %s3125_s14, 256, %s104_s5, [#allocation12], %s2482_s9, %s2482_s9, %s2483_s23  }
  0x43   :  { %2468 = dma.done.wait [#allocation3], 128  }
  0x44   :  { %2469 = vsyncadd [#allocation3], 4294967168 }
  0x45   :  { %2470 = dma.done.wait [#allocation6], 512  }
  0x46   :  { %2471 = vsyncadd [#allocation6], 4294966784 }
  0x47   :  { %2472 = dma.done.wait [#allocation9], 768  }
  0x48   :  { %2473 = vsyncadd [#allocation9], 4294966528 }
  0x49   :  { %2474 = dma.done.wait [#allocation12], 256  }
  0x4a   :  { %2475 = vsyncadd [#allocation12], 4294967040  ;;  %vm184_vm0 = vcmask 195584   ;;  %s3130_s20 = sld [smem:[#allocation19_spill]]  ;;  %v2616_v2 = vld [vmem:[%s3115_s4] sm:$0xff]  ;;  %v2626_v4 = vld [vmem:[%s3115_s4 + $0x8] sm:$0xff] }
  0x4b   :  { %2053 = vmatprep.mubr.msk.f32.mxu0 %vm184_vm0, %v2616_v2  ;;  %v408_v5 = vld [vmem:[%s3112_s1 + $0x8] sm:$0xff]  ;;  %v2634_v6 = vld [vmem:[%s3115_s4 + $0x10] sm:$0xff]  ;;  %v407_v7 = vld [vmem:[%s3112_s1] sm:$0xff]  ;;  %vm409_vm1 = vcmask 130048   ;;  %v2486_v17 = vmov 0.0   ;;  %s2487_s7 = smov 12  }
  0x4c   :  { %v2646_v8 = vld [vmem:[%s3115_s4 + $0x18] sm:$0xff]  ;;  %v2651_v9 = vld [vmem:[%s3115_s4 + $0x20] sm:$0xff]  ;;  %v2660_v10 = vld [vmem:[%s3115_s4 + $0x28] sm:$0xff]  ;;  %2062 = vmatprep.subr.mxu1 %v2486_v17  ;;  %s2488_s25 = smov 36   ;;  %s2489_s5 = smov 24   ;;  %vm2490_vm2 = vmmov 0  }
  0x4d   :  { %v2665_v11 = vld [vmem:[%s3117_s6] sm:$0xff]  ;;  %v2674_v12 = vld [vmem:[%s3117_s6 + $0x8] sm:$0xff]  ;;  %v2679_v13 = vld [vmem:[%s3117_s6 + $0x10] sm:$0xff]  ;;  %2080 = vmatprep.mubr.msk.f32.mxu1 %vm2490_vm2, %v2486_v17  ;;  %v2491_v38 = vmov 0   ;;  %s2493_s18 = smov 48   ;;  %vm318_vm3 = vcmask 97280  }
  0x4e   :  { %v2688_v14 = vld [vmem:[%s3117_s6 + $0x18] sm:$0xff]  ;;  %v2693_v15 = vld [vmem:[%s3117_s6 + $0x20] sm:$0xff]  ;;  %v2702_v16 = vld [vmem:[%s3117_s6 + $0x28] sm:$0xff]  ;;  %2324 = vset.pattern.permute.xlu0 %v2491_v38  ;;  %2325 = vset.pattern.permute.xlu1 %v2491_v38  ;;  %s2492_s6 = smov 60   ;;  %vm321_vm4 = vcmask 293888   ;;  %vm325_vm5 = vcmask 490496  }
  0x4f   :  { %v2710_v18 = vld [vmem:[%s3114_s3 + $0x40] sm:$0xff]  ;;  %v2719_v19 = vld [vmem:[%s3114_s3 + $0x38] sm:$0xff]  ;;  %v2728_v21 = vld [vmem:[%s3114_s3 + $0x30] sm:$0xff]  ;;  %vm323_vm6 = vcmask 392192   ;;  %vm332_vm7 = vcmask 588800   ;;  %vm735_vm8 = vcmask 1043456  }
  0x50   :  { %v183_v0 = vld [vmem:[%s3130_s20 + $0x10] sm:$0xff]  ;;  %v182_v1 = vld [vmem:[%s3130_s20 + $0x8] sm:$0xff]  ;;  %v181_v3 = vld [vmem:[%s3130_s20] sm:$0xff]  ;;  %2063 = vmatpush3.msra.mxu1 %v2710_v18  ;;  %vm1400_vm9 = vcmask 64512  }
  0x51   :  { %2047 = vmatprep.subr.mxu0 %v183_v0  ;;  %2064 = vmatprep.subr.mxu1 %v2486_v17  ;;  %v2739_v23 = vld [vmem:[%s3114_s3 + $0x28] sm:$0xff]  ;;  %v2748_v25 = vld [vmem:[%s3114_s3 + $0x20] sm:$0xff]  ;;  %v2758_v27 = vld [vmem:[%s3114_s3 + $0x18] sm:$0xff] }
  0x52   :  { %2048 = vmatpush3.msra.mxu0 %v183_v0  ;;  %2065 = vmatpush3.msra.mxu1 %v2719_v19  ;;  %v2767_v29 = vld [vmem:[%s3114_s3 + $0x10] sm:$0xff]  ;;  %v2776_v31 = vld [vmem:[%s3114_s3 + $0x8] sm:$0xff]  ;;  %v2785_v33 = vld [vmem:[%s3114_s3] sm:$0xff] }
  0x53   :  { %2049 = vmatprep.subr.mxu0 %v182_v1  ;;  %2066 = vmatprep.subr.mxu1 %v2486_v17  ;;  %v1874_v36 = vld [vmem:[%s3130_s20 + $0x28] sm:$0xff]  ;;  %v174_v42 = vld [vmem:[#allocation2] sm:$0xff]  ;;  %v1872_v63 = vld [vmem:[%s3130_s20 + $0x18] sm:$0xff] }
  0x54   :  { %2050 = vmatpush3.msra.mxu0 %v182_v1  ;;  %2067 = vmatpush3.msra.mxu1 %v2728_v21  ;;  %v175_v41 = vld [vmem:[#allocation5] sm:$0xff]  ;;  %v1873_v59 = vld [vmem:[%s3130_s20 + $0x20] sm:$0xff] }
  0x55   :  { %2051 = vmatprep.subr.mxu0 %v181_v3  ;;  %2068 = vmatprep.subr.mxu1 %v2486_v17  ;;  %v627_v1 = vld [vmem:[%s3113_s2] sm:$0xff] }
  0x56   :  { %2052 = vmatpush3.msra.mxu0 %v181_v3  ;;  %2069 = vmatpush3.msra.mxu1 %v2739_v23  ;;  %v1882_v3 = vld [vmem:[%s3112_s1 + $0x10] sm:$0xff] }
  0x57   :  { %2054 = vmatmul.mubr.msk.f32.vlgmr.msra.gmra.mxu0 %vm184_vm0, %v2626_v4  ;;  %2083 = vmatprep.subr.mxu0 %v408_v5 }
  0x58   :  { %2056 = vmatprep.mubr.msk.f32.mxu0 %vm184_vm0, %v2634_v6  ;;  %2084 = vmatpush3.msra.mxu0 %v408_v5 }
  0x59   :  { %2085 = vmatprep.subr.mxu0 %v407_v7  ;;  %2070 = vmatprep.subr.mxu1 %v2486_v17 }
  0x5a   :  { %2086 = vmatpush3.msra.mxu0 %v407_v7  ;;  %2071 = vmatpush3.msra.mxu1 %v2748_v25 }
  0x5b   :  { %2057 = vmatmul.mubr.msk.f32.gmra.mxu0 %vm184_vm0, %v2646_v8  ;;  %2096 = vmatprep.subr.mxu0 %v2486_v17 }
  0x5c   :  { %2059 = vmatprep.mubr.msk.f32.mxu0 %vm184_vm0, %v2651_v9  ;;  %2072 = vmatprep.subr.mxu1 %v2486_v17 }
  0x5d   :  { %2073 = vmatpush3.msra.mxu1 %v2758_v27 }
  0x5e   :  { %2074 = vmatprep.subr.mxu1 %v2486_v17 }
  0x5f   :  { %2060 = vmatmul.mubr.msk.f32.gmra.mxu0 %vm184_vm0, %v2660_v10  ;;  %2075 = vmatpush3.msra.mxu1 %v2767_v29 }
  0x60   :  { %2087 = vmatprep.mubr.msk.f32.mxu0 %vm409_vm1, %v2665_v11  ;;  %2076 = vmatprep.subr.mxu1 %v2486_v17 }
  0x61   :  { %2077 = vmatpush3.msra.mxu1 %v2776_v31 }
  0x62   :  { %2078 = vmatprep.subr.mxu1 %v2486_v17 }
  0x63   :  { %2088 = vmatmul.mubr.msk.f32.vlgmr.msra.gmra.mxu0 %vm409_vm1, %v2674_v12  ;;  %2079 = vmatpush3.msra.mxu1 %v2785_v33 }
  0x64   :  { %2090 = vmatprep.mubr.msk.f32.mxu0 %vm409_vm1, %v2679_v13  ;;  %2097 = vmatpush3.msra.mxu0 %v2710_v18 }
  0x65   :  { %2098 = vmatprep.subr.mxu0 %v2486_v17  ;;  %2117 = vmatprep.subr.mxu1 %v2486_v17 }
  0x66   :  { %2099 = vmatpush3.msra.mxu0 %v2719_v19 }
  0x67   :  { %2091 = vmatmul.mubr.msk.f32.gmra.mxu0 %vm409_vm1, %v2688_v14  ;;  %2100 = vmatprep.subr.mxu0 %v2486_v17 }
  0x68   :  { %2093 = vmatprep.mubr.msk.f32.mxu0 %vm409_vm1, %v2693_v15  ;;  %2101 = vmatpush3.msra.mxu0 %v2728_v21 }
  0x69   :  { %2102 = vmatprep.subr.mxu0 %v2486_v17 }
  0x6a   :  { %2103 = vmatpush3.msra.mxu0 %v2739_v23 }
  0x6b   :  { %2094 = vmatmul.mubr.msk.f32.gmra.mxu0 %vm409_vm1, %v2702_v16  ;;  %2104 = vmatprep.subr.mxu0 %v2486_v17 }
  0x6c   :  { %2105 = vmatpush3.msra.mxu0 %v2748_v25  ;;  %2114 = vmatprep.mubr.msk.f32.mxu0 %vm2490_vm2, %v2486_v17 }
  0x6d   :  { %2106 = vmatprep.subr.mxu0 %v2486_v17 }
  0x6e   :  { %2107 = vmatpush3.msra.mxu0 %v2758_v27 }
  0x6f   :  { %2108 = vmatprep.subr.mxu0 %v2486_v17 }
  0x70   :  { %2109 = vmatpush3.msra.mxu0 %v2767_v29 }
  0x71   :  { %2110 = vmatprep.subr.mxu0 %v2486_v17 }
  0x72   :  { %2111 = vmatpush3.msra.mxu0 %v2776_v31 }
  0x73   :  { %2112 = vmatprep.subr.mxu0 %v2486_v17 }
  0x74   :  { %2113 = vmatpush3.msra.mxu0 %v2785_v33 }
  0x75   :  { %2145 = vmatprep.subr.mxu0 %v1874_v36 }
 0x117   :  { %v2055_v20 = vpop.f32.mrf.mxu0 }
 0x118   :  { %299 = vrot.lane.b32.xlu1 %v2055_v20, %s2487_s7  ;;  %v2908_v20 = vld [vmem:[#allocation10 + $0x20] sm:$0xf] }
 0x119   :  { %v2733_v22 = vpop.f32.mrf.mxu0 }
 0x11b   :  { %v2058_v24 = vpop.f32.mrf.mxu0 }
 0x11c   :  { %307 = vrot.lane.b32.xlu0 %v2058_v24, %s2488_s25 }
 0x11d   :  { %v279_v26 = vpop.f32.mrf.mxu0 }
 0x11f   :  { %v2061_v28 = vpop.f32.mrf.mxu0 }
 0x120   :  { %303 = vrot.lane.b32.xlu0 %v279_v26, %s2489_s5 }
 0x121   :  { %v289_v30 = vpop.f32.mrf.mxu0 }
 0x123   :  { %v2089_v32 = vpop.f32.mrf.mxu0 }
 0x124   :  { %524 = vrot.lane.b32.xlu0 %v2089_v32, %s2487_s7  ;;  %v2919_v32 = vld [vmem:[#allocation10 + $0x10] sm:$0xff] }
 0x125   :  { %v494_v34 = vpop.f32.mrf.mxu0 }
 0x127   :  { %v2092_v35 = vpop.f32.mrf.mxu0 }
 0x128   :  { %532 = vrot.lane.b32.xlu1 %v2092_v35, %s2488_s25  ;;  %v2922_v35 = vld [vmem:[#allocation10 + $0x8] sm:$0xff] }
 0x129   :  { %v504_v37 = vpop.f32.mrf.mxu0 }
 0x12a   :  { %528 = vrot.lane.b32.xlu0 %v504_v37, %s2489_s5 }
 0x12b   :  { %v2095_v39 = vpop.f32.mrf.mxu0 }
 0x12c   :  { %540 = vrot.lane.b32.xlu1 %v2095_v39, %s2492_s6 }
 0x12d   :  { %v514_v40 = vpop.f32.mrf.mxu0 }
 0x12e   :  { %311 = vrot.lane.b32.xlu0 %v289_v30, %s2493_s18 }
 0x130   :  { %536 = vrot.lane.b32.xlu1 %v514_v40, %s2493_s18 }
 0x132   :  { %550 = vperm.xlu0 %2324, %v175_v41  }
 0x134   :  { %315 = vrot.lane.b32.xlu1 %v2061_v28, %s2492_s6 }
 0x138   :  { %329 = vperm.xlu1 %2325, %v174_v42  }
 0x18a   :  { %v300_v45 = vpop.permute.xlu1 %299 }
 0x18b   :  { %v319_v52 = vsel %vm318_vm3, %v2733_v22, %v300_v45  ;;  %v2910_v22 = vld [vmem:[#allocation10 + $0x18] sm:$0xff] }
 0x18e   :  { %v308_v43 = vpop.permute.xlu0 %307 }
 0x192   :  { %v304_v44 = vpop.permute.xlu0 %303 }
 0x193   :  { %v320_v53 = vsel %vm184_vm0, %v319_v52, %v304_v44 }
 0x194   :  { %v322_v60 = vsel %vm321_vm4, %v320_v53, %v308_v43 }
 0x196   :  { %v525_v46 = vpop.permute.xlu0 %524 }
 0x197   :  { %v543_v49 = vsel %vm318_vm3, %v494_v34, %v525_v46 }
 0x19a   :  { %v533_v47 = vpop.permute.xlu1 %532 }
 0x19c   :  { %v529_v48 = vpop.permute.xlu0 %528 }
 0x19d   :  { %v544_v51 = vsel %vm184_vm0, %v543_v49, %v529_v48 }
 0x19e   :  { %v541_v50 = vpop.permute.xlu1 %540  ;;  %v545_v54 = vsel %vm321_vm4, %v544_v51, %v533_v47 }
 0x1a0   :  { %v312_v56 = vpop.permute.xlu0 %311 }
 0x1a1   :  { %v324_v61 = vsel %vm323_vm6, %v322_v60, %v312_v56 }
 0x1a2   :  { %v537_v55 = vpop.permute.xlu1 %536 }
 0x1a3   :  { %v546_v57 = vsel %vm323_vm6, %v545_v54, %v537_v55 }
 0x1a4   :  { %v547_v58 = vsel %vm325_vm5, %v546_v57, %v541_v50 }
 0x1a5   :  { %2115 = vmatmul.mubr.msk.f32.vlgmr.msra.gmra.mxu0 %vm332_vm7, %v547_v58 }
 0x1a6   :  { %v316_v62 = vpop.permute.xlu1 %315  ;;  %2146 = vmatpush3.msra.mxu0 %v1874_v36  ;;  %2151 = vmatprep.mubr.msk.f32.mxu0 %vm184_vm0, %v2616_v2  ;;  %v1883_v2 = vld [vmem:[%s3112_s1 + $0x18] sm:$0xff]  ;;  %v2927_v36 = vld [vmem:[#allocation10] sm:$0xff] }
 0x1a7   :  { %v326_v0 = vsel %vm325_vm5, %v324_v61, %v316_v62  ;;  %2147 = vmatprep.subr.mxu0 %v1873_v59 }
 0x1a8   :  { %2081 = vmatmul.mubr.msk.f32.vlgmr.msra.gmra.mxu1 %vm332_vm7, %v326_v0  ;;  %2148 = vmatpush3.msra.mxu0 %v1873_v59 }
 0x1a9   :  { %2149 = vmatprep.subr.mxu0 %v1872_v63  ;;  %2123 = vmatprep.mubr.msk.f32.mxu1 %vm2490_vm2, %v2486_v17 }
 0x1aa   :  { %2150 = vmatpush3.msra.mxu0 %v1872_v63  ;;  %2118 = vmatpush3.msra.mxu1 %v627_v1 }
 0x1ab   :  { %2152 = vmatmul.mubr.msk.f32.vlgmr.msra.gmra.mxu0 %vm184_vm0, %v2626_v4  ;;  %2119 = vmatprep.subr.mxu1 %v2486_v17 }
 0x1ac   :  { %2154 = vmatprep.mubr.msk.f32.mxu0 %vm184_vm0, %v2634_v6  ;;  %2181 = vmatprep.subr.mxu0 %v1883_v2 }
 0x1ad   :  { %2182 = vmatpush3.msra.mxu0 %v1883_v2  ;;  %v2882_v4 = vpop.permute.xlu0 %550 }
 0x1ae   :  { %2183 = vmatprep.subr.mxu0 %v1882_v3 }
 0x1af   :  { %2155 = vmatmul.mubr.msk.f32.gmra.mxu0 %vm184_vm0, %v2646_v8 }
 0x1b0   :  { %2157 = vmatprep.mubr.msk.f32.mxu0 %vm184_vm0, %v2651_v9  ;;  %2184 = vmatpush3.msra.mxu0 %v1882_v3 }
 0x1b1   :  { %2194 = vmatprep.subr.mxu0 %v2486_v17 }
 0x1b3   :  { %2158 = vmatmul.mubr.msk.f32.gmra.mxu0 %vm184_vm0, %v2660_v10  ;;  %v2885_v7 = vpop.permute.xlu1 %329 }
 0x1b4   :  { %2185 = vmatprep.mubr.msk.f32.mxu0 %vm409_vm1, %v2665_v11 }
 0x1b7   :  { %2186 = vmatmul.mubr.msk.f32.vlgmr.msra.gmra.mxu0 %vm409_vm1, %v2674_v12 }
 0x1b8   :  { %2188 = vmatprep.mubr.msk.f32.mxu0 %vm409_vm1, %v2679_v13  ;;  %2195 = vmatpush3.msra.mxu0 %v2710_v18 }
 0x1b9   :  { %2196 = vmatprep.subr.mxu0 %v2486_v17 }
 0x1ba   :  { %2197 = vmatpush3.msra.mxu0 %v2719_v19 }
 0x1bb   :  { %2189 = vmatmul.mubr.msk.f32.gmra.mxu0 %vm409_vm1, %v2688_v14  ;;  %2198 = vmatprep.subr.mxu0 %v2486_v17  ;;  %v2889_v14 = vld [vmem:[#allocation7] sm:$0xff] }
 0x1bc   :  { %2191 = vmatprep.mubr.msk.f32.mxu0 %vm409_vm1, %v2693_v15  ;;  %2199 = vmatpush3.msra.mxu0 %v2728_v21  ;;  %v2896_v15 = vld [vmem:[#allocation7 + $0x8] sm:$0xff] }
 0x1bd   :  { %2200 = vmatprep.subr.mxu0 %v2486_v17 }
 0x1be   :  { %2201 = vmatpush3.msra.mxu0 %v2739_v23 }
 0x1bf   :  { %2192 = vmatmul.mubr.msk.f32.gmra.mxu0 %vm409_vm1, %v2702_v16  ;;  %2202 = vmatprep.subr.mxu0 %v2486_v17  ;;  %v2902_v16 = vld [vmem:[#allocation7 + $0x10] sm:$0xff] }
 0x1c0   :  { %2203 = vmatpush3.msra.mxu0 %v2748_v25  ;;  %2212 = vmatprep.mubr.msk.f32.mxu0 %vm2490_vm2, %v2486_v17 }
 0x1c1   :  { %2204 = vmatprep.subr.mxu0 %v2486_v17 }
 0x1c2   :  { %2205 = vmatpush3.msra.mxu0 %v2758_v27 }
 0x1c3   :  { %2206 = vmatprep.subr.mxu0 %v2486_v17 }
 0x1c4   :  { %2207 = vmatpush3.msra.mxu0 %v2767_v29 }
 0x1c5   :  { %2208 = vmatprep.subr.mxu0 %v2486_v17 }
 0x1c6   :  { %2209 = vmatpush3.msra.mxu0 %v2776_v31 }
 0x1c7   :  { %2210 = vmatprep.subr.mxu0 %v2486_v17 }
 0x1c8   :  { %2211 = vmatpush3.msra.mxu0 %v2785_v33 }
 0x265   :  { %v622_v5 = vpop.f32.mrf.mxu0 }
 0x266   :  { %v623_v6 = vadd.f32 %v622_v5, %v2882_v4 }
 0x267   :  { %v2116_v8 = vpop.f32.mrf.mxu0 }
 0x268   :  { %v626_v9 = vmax.f32 %v623_v6, 0.0  ;;  %v402_v10 = vpop.f32.mrf.mxu1 }
 0x269   :  { %v403_v11 = vadd.f32 %v402_v10, %v2885_v7 }
 0x26a   :  { %v2082_v12 = vpop.f32.mrf.mxu1  ;;  %2120 = vmatpush3.msra.mxu1 %v626_v9 }
 0x26b   :  { %v406_v13 = vmax.f32 %v403_v11, 0.0  ;;  %2121 = vmatprep.subr.mxu1 %v2486_v17  ;;  %v2153_v24 = vpop.f32.mrf.mxu0 }
 0x26d   :  { %2122 = vmatpush3.msra.mxu1 %v406_v13  ;;  %v2917_v26 = vpop.f32.mrf.mxu0 }
 0x26e   :  { %2124 = vmatmul.mubr.msk.f32.vlgmr.msra.gmra.mxu1 %vm184_vm0, %v2889_v14  ;;  %2132 = vmatprep.subr.mxu1 %v2486_v17 }
 0x26f   :  { %2126 = vmatprep.mubr.msk.f32.mxu1 %vm2490_vm2, %v2486_v17  ;;  %2133 = vmatpush3.msk.msra.mxu1 %vm735_vm8, %v2908_v20  ;;  %v2156_v28 = vpop.f32.mrf.mxu0 }
 0x270   :  { %2134 = vmatprep.subr.mxu1 %v2486_v17 }
 0x271   :  { %2135 = vmatpush3.msra.mxu1 %v2910_v22  ;;  %v889_v30 = vpop.f32.mrf.mxu0 }
 0x272   :  { %2127 = vmatmul.mubr.msk.f32.gmra.mxu1 %vm184_vm0, %v2896_v15  ;;  %2136 = vmatprep.subr.mxu1 %v2486_v17 }
 0x273   :  { %2129 = vmatprep.mubr.msk.f32.mxu1 %vm2490_vm2, %v2486_v17  ;;  %v2159_v34 = vpop.f32.mrf.mxu0  ;;  %2137 = vmatpush3.msra.mxu1 %v2919_v32 }
 0x274   :  { %2138 = vmatprep.subr.mxu1 %v2486_v17 }
 0x275   :  { %2139 = vmatpush3.msra.mxu1 %v2922_v35  ;;  %v899_v37 = vpop.f32.mrf.mxu0 }
 0x276   :  { %2130 = vmatmul.mubr.msk.f32.gmra.mxu1 %vm184_vm0, %v2902_v16  ;;  %2140 = vmatprep.subr.mxu1 %v2486_v17 }
 0x277   :  { %2142 = vmatprep.mubr.msk.f32.mxu1 %vm2490_vm2, %v2486_v17  ;;  %2141 = vmatpush3.msra.mxu1 %v2927_v36  ;;  %v2187_v39 = vpop.f32.mrf.mxu0 }
 0x278   :  { %2160 = vmatprep.subr.mxu1 %v2486_v17 }
 0x279   :  { %v1076_v42 = vpop.f32.mrf.mxu0 }
 0x27b   :  { %v2190_v45 = vpop.f32.mrf.mxu0 }
 0x27d   :  { %v1086_v47 = vpop.f32.mrf.mxu0 }
 0x27f   :  { %v2193_v48 = vpop.f32.mrf.mxu0 }
 0x281   :  { %v1096_v49 = vpop.f32.mrf.mxu0 }
 0x32e   :  { %v703_v38 = vpop.f32.mrf.mxu1 }
 0x330   :  { %v2125_v40 = vpop.f32.mrf.mxu1 }
 0x332   :  { %v708_v41 = vpop.f32.mrf.mxu1 }
 0x333   :  { %718 = vrot.lane.b32.xlu1 %v708_v41, %s2487_s7 }
 0x334   :  { %v2128_v43 = vpop.f32.mrf.mxu1 }
 0x336   :  { %v713_v44 = vpop.f32.mrf.mxu1 }
 0x337   :  { %1106 = vrot.lane.b32.xlu1 %v2187_v39, %s2487_s7  ;;  %722 = vrot.lane.b32.xlu0 %v713_v44, %s2489_s5 }
 0x338   :  { %v2131_v46 = vpop.f32.mrf.mxu1 }
 0x33b   :  { %909 = vrot.lane.b32.xlu1 %v2153_v24, %s2487_s7  ;;  %1110 = vrot.lane.b32.xlu0 %v1086_v47, %s2489_s5  ;;  %v178_v47 = vld [vmem:[%s3122_s11] sm:$0xff] }
 0x33f   :  { %913 = vrot.lane.b32.xlu1 %v889_v30, %s2489_s5  ;;  %1114 = vrot.lane.b32.xlu0 %v2190_v45, %s2488_s25 }
 0x343   :  { %917 = vrot.lane.b32.xlu1 %v2156_v28, %s2488_s25  ;;  %1118 = vrot.lane.b32.xlu0 %v1096_v49, %s2493_s18 }
 0x347   :  { %921 = vrot.lane.b32.xlu1 %v899_v37, %s2493_s18  ;;  %1122 = vrot.lane.b32.xlu0 %v2193_v48, %s2492_s6 }
 0x34b   :  { %925 = vrot.lane.b32.xlu0 %v2159_v34, %s2492_s6 }
 0x3a5   :  { %v719_v50 = vpop.permute.xlu1 %718 }
 0x3a6   :  { %v725_v51 = vsel %vm318_vm3, %v703_v38, %v719_v50 }
 0x3a9   :  { %v1107_v52 = vpop.permute.xlu1 %1106  ;;  %v723_v53 = vpop.permute.xlu0 %722 }
 0x3aa   :  { %v726_v54 = vsel %vm184_vm0, %v725_v51, %v723_v53  ;;  %v177_v51 = vld [vmem:[%s3121_s10] sm:$0xff] }
 0x3ab   :  { %2143 = vmatmul.mubr.msk.f32.vlgmr.msra.gmra.mxu1 %vm321_vm4, %v726_v54  ;;  %v168_v54 = vld [vmem:[%s3124_s13] sm:$0xff] }
 0x3ac   :  { %2161 = vmatpush3.msra.mxu1 %v2710_v18  ;;  %2178 = vmatprep.mubr.msk.f32.mxu1 %vm2490_vm2, %v2486_v17 }
 0x3ad   :  { %v910_v55 = vpop.permute.xlu1 %909  ;;  %v1111_v56 = vpop.permute.xlu0 %1110  ;;  %2162 = vmatprep.subr.mxu1 %v2486_v17 }
 0x3ae   :  { %2163 = vmatpush3.msra.mxu1 %v2719_v19  ;;  %v1125_v19 = vsel %vm318_vm3, %v1076_v42, %v1107_v52 }
 0x3af   :  { %2164 = vmatprep.subr.mxu1 %v2486_v17 }
 0x3b0   :  { %2165 = vmatpush3.msra.mxu1 %v2728_v21  ;;  %v1126_v21 = vsel %vm184_vm0, %v1125_v19, %v1111_v56 }
 0x3b1   :  { %v914_v57 = vpop.permute.xlu1 %913  ;;  %v1115_v58 = vpop.permute.xlu0 %1114  ;;  %2166 = vmatprep.subr.mxu1 %v2486_v17 }
 0x3b2   :  { %2167 = vmatpush3.msra.mxu1 %v2739_v23  ;;  %v1127_v60 = vsel %vm321_vm4, %v1126_v21, %v1115_v58 }
 0x3b3   :  { %2168 = vmatprep.subr.mxu1 %v2486_v17 }
 0x3b4   :  { %2169 = vmatpush3.msra.mxu1 %v2748_v25  ;;  %v928_v25 = vsel %vm318_vm3, %v2917_v26, %v910_v55 }
 0x3b5   :  { %v918_v18 = vpop.permute.xlu1 %917  ;;  %v1119_v59 = vpop.permute.xlu0 %1118  ;;  %2170 = vmatprep.subr.mxu1 %v2486_v17 }
 0x3b6   :  { %2171 = vmatpush3.msra.mxu1 %v2758_v27  ;;  %v1128_v23 = vsel %vm323_vm6, %v1127_v60, %v1119_v59  ;;  %v929_v27 = vsel %vm184_vm0, %v928_v25, %v914_v57  ;;  %v169_v60 = vld [vmem:[%s3124_s13 + $0x8] sm:$0xff]  ;;  %v172_v25 = vld [vmem:[%s3124_s13 + $0x20] sm:$0xff] }
 0x3b7   :  { %2172 = vmatprep.subr.mxu1 %v2486_v17 }
 0x3b8   :  { %2173 = vmatpush3.msra.mxu1 %v2767_v29  ;;  %v930_v29 = vsel %vm321_vm4, %v929_v27, %v918_v18  ;;  %v151_v27 = vld [vmem:[%s3126_s15 + $0x38] sm:$0xff] }
 0x3b9   :  { %v1123_v61 = vpop.permute.xlu0 %1122  ;;  %2174 = vmatprep.subr.mxu1 %v2486_v17  ;;  %v922_v62 = vpop.permute.xlu1 %921 }
 0x3ba   :  { %v1129_v63 = vsel %vm325_vm5, %v1128_v23, %v1123_v61  ;;  %2175 = vmatpush3.msra.mxu1 %v2776_v31  ;;  %v931_v0 = vsel %vm323_vm6, %v930_v29, %v922_v62  ;;  %v1891_v31 = vld [vmem:[%s3113_s2 + $0x8] sm:$0xff]  ;;  %v170_v23 = vld [vmem:[%s3124_s13 + $0x10] sm:$0xff]  ;;  %v171_v61 = vld [vmem:[%s3124_s13 + $0x18] sm:$0xff] }
 0x3bb   :  { %2213 = vmatmul.mubr.msk.f32.vlgmr.msra.gmra.mxu0 %vm332_vm7, %v1129_v63  ;;  %2176 = vmatprep.subr.mxu1 %v2486_v17  ;;  %v173_v62 = vld [vmem:[%s3124_s13 + $0x28] sm:$0xff]  ;;  %v152_v63 = vld [vmem:[%s3126_s15 + $0x40] sm:$0xff]  ;;  %v150_v29 = vld [vmem:[%s3126_s15 + $0x30] sm:$0xff] }
 0x3bc   :  { %2177 = vmatpush3.msra.mxu1 %v2785_v33  ;;  %2277 = vmatprep.mubr.msk.f32.mxu0 %vm1400_vm9, %v168_v54 }
 0x3bd   :  { %v926_v1 = vpop.permute.xlu0 %925  ;;  %2215 = vmatprep.subr.mxu1 %v2486_v17 }
 0x3be   :  { %v932_v2 = vsel %vm325_vm5, %v931_v0, %v926_v1  ;;  %v149_v0 = vld [vmem:[%s3126_s15 + $0x28] sm:$0xff]  ;;  %v148_v1 = vld [vmem:[%s3126_s15 + $0x20] sm:$0xff] }
 0x3bf   :  { %2179 = vmatmul.mubr.msk.f32.vlgmr.msra.gmra.mxu1 %vm332_vm7, %v932_v2  ;;  %v147_v2 = vld [vmem:[%s3126_s15 + $0x18] sm:$0xff] }
 0x3c0   :  { %2221 = vmatprep.mubr.msk.f32.mxu1 %vm2490_vm2, %v2486_v17  ;;  %2216 = vmatpush3.msra.mxu1 %v1891_v31  ;;  %v146_v31 = vld [vmem:[%s3126_s15 + $0x10] sm:$0xff] }
 0x3c1   :  { %2217 = vmatprep.subr.mxu1 %v2486_v17 }
 0x46b   :  { %v805_v33 = vpop.f32.mrf.mxu1 }
 0x46d   :  { %v2144_v3 = vpop.f32.mrf.mxu1 }
 0x47b   :  { %v1199_v5 = vpop.f32.mrf.mxu0 }
 0x47c   :  { %v1200_v6 = vadd.f32 %v1199_v5, %v2882_v4  ;;  %v145_v5 = vld [vmem:[%s3126_s15 + $0x8] sm:$0xff] }
 0x47d   :  { %v2214_v8 = vpop.f32.mrf.mxu0 }
 0x47e   :  { %v1203_v9 = vmax.f32 %v1200_v6, 0.0 }
 0x47f   :  { %v1002_v10 = vpop.f32.mrf.mxu1 }
 0x480   :  { %v1003_v11 = vadd.f32 %v1002_v10, %v2885_v7  ;;  %2218 = vmatpush3.msra.mxu1 %v1203_v9  ;;  %v144_v9 = vld [vmem:[%s3126_s15] sm:$0xff]  ;;  %s2494_s15 = smov [#allocation13]  }
 0x481   :  { %v2180_v12 = vpop.f32.mrf.mxu1  ;;  %2219 = vmatprep.subr.mxu1 %v2486_v17 }
 0x482   :  { %v1006_v13 = vmax.f32 %v1003_v11, 0.0 }
 0x484   :  { %2220 = vmatpush3.msra.mxu1 %v1006_v13 }
 0x485   :  { %2222 = vmatmul.mubr.msk.f32.vlgmr.msra.gmra.mxu1 %vm184_vm0, %v2889_v14  ;;  %2230 = vmatprep.subr.mxu1 %v2486_v17 }
 0x486   :  { %2224 = vmatprep.mubr.msk.f32.mxu1 %vm2490_vm2, %v2486_v17  ;;  %2231 = vmatpush3.msk.msra.mxu1 %vm735_vm8, %v2908_v20  ;;  %v176_v20 = vld [vmem:[#allocation8] sm:$0xff] }
 0x487   :  { %2232 = vmatprep.subr.mxu1 %v2486_v17 }
 0x488   :  { %2233 = vmatpush3.msra.mxu1 %v2910_v22 }
 0x489   :  { %2225 = vmatmul.mubr.msk.f32.gmra.mxu1 %vm184_vm0, %v2896_v15  ;;  %2234 = vmatprep.subr.mxu1 %v2486_v17 }
 0x48a   :  { %2227 = vmatprep.mubr.msk.f32.mxu1 %vm2490_vm2, %v2486_v17  ;;  %2235 = vmatpush3.msra.mxu1 %v2919_v32 }
 0x48b   :  { %2236 = vmatprep.subr.mxu1 %v2486_v17 }
 0x48c   :  { %2237 = vmatpush3.msra.mxu1 %v2922_v35 }
 0x48d   :  { %2228 = vmatmul.mubr.msk.f32.gmra.mxu1 %vm184_vm0, %v2902_v16  ;;  %2238 = vmatprep.subr.mxu1 %v2486_v17 }
 0x48e   :  { %2239 = vmatpush3.msra.mxu1 %v2927_v36  ;;  %2240 = vmatprep.mubr.msk.f32.mxu1 %vm2490_vm2, %v2486_v17 }
 0x545   :  { %v1272_v4 = vpop.f32.mrf.mxu1 }
 0x547   :  { %v2223_v7 = vpop.f32.mrf.mxu1 }
 0x549   :  { %v1277_v14 = vpop.f32.mrf.mxu1 }
 0x54a   :  { %1287 = vrot.lane.b32.xlu1 %v1277_v14, %s2487_s7 }
 0x54b   :  { %v2226_v15 = vpop.f32.mrf.mxu1 }
 0x54d   :  { %v1282_v22 = vpop.f32.mrf.mxu1 }
 0x54e   :  { %729 = vperm.xlu1 %2325, %v176_v20   ;;  %1291 = vrot.lane.b32.xlu0 %v1282_v22, %s2489_s5  ;;  %v179_v20 = vld [vmem:[#allocation11] sm:$0xff]  ;;  %v180_v22 = vld [vmem:[#allocation11 + $0x8] sm:$0xff] }
 0x54f   :  { %v2229_v24 = vpop.f32.mrf.mxu1 }
 0x5bc   :  { %v1288_v16 = vpop.permute.xlu1 %1287 }
 0x5bd   :  { %v1294_v26 = vsel %vm318_vm3, %v1272_v4, %v1288_v16 }
 0x5c0   :  { %v1292_v28 = vpop.permute.xlu0 %1291 }
 0x5c1   :  { %v1295_v30 = vsel %vm184_vm0, %v1294_v26, %v1292_v28 }
 0x5c2   :  { %2241 = vmatmul.mubr.msk.f32.vlgmr.msra.gmra.mxu1 %vm321_vm4, %v1295_v30 }
 0x5c3   :  { %2245 = vmatprep.mubr.msk.f32.mxu1 %vm1400_vm9, %v168_v54 }
 0x5c9   :  { %v730_v17 = vpop.permute.xlu1 %729 }
 0x5ca   :  { %v806_v34 = vadd.f32 %v805_v33, %v730_v17 }
 0x682   :  { %v1365_v32 = vpop.f32.mrf.mxu1 }
 0x683   :  { %v1366_v35 = vadd.f32 %v1365_v32, %v730_v17 }
 0x684   :  { %v2242_v36 = vpop.f32.mrf.mxu1 }
 0x685   :  { %v1369_v37 = vadd.f32 %v1366_v35, %v806_v34 }
 0x687   :  { %v1370_v38 = vsel %vm184_vm0, %v1369_v37, 0.0 }
 0x688   :  { %1371 = vadd.xlane.f32.xlu0 %v1370_v38 }
 0x711   :  { %v1372_v39 = vpop.xlane.xlu0 %1371 }
 0x712   :  { %v1374_v40 = vmul.f32 0.020833334, %v1372_v39 }
 0x714   :  { %v1375_v41 = vsub.f32 %v806_v34, %v1374_v40  ;;  %v1377_v42 = vsub.f32 %v1366_v35, %v1374_v40 }
 0x716   :  { %v1376_v43 = vmul.f32 %v1375_v41, %v1375_v41  ;;  %v1378_v44 = vmul.f32 %v1377_v42, %v1377_v42 }
 0x718   :  { %v1379_v45 = vadd.f32 %v1378_v44, %v1376_v43 }
 0x71a   :  { %v1380_v46 = vsel %vm184_vm0, %v1379_v45, 0.0 }
 0x71b   :  { %1381 = vadd.xlane.f32.xlu1 %v1380_v46 }
 0x72c   :  { %1395 = vperm.xlu1 %2325, %v178_v47  }
 0x7a4   :  { %v1382_v48 = vpop.xlane.xlu1 %1381 }
 0x7a5   :  { %v1383_v49 = vmul.f32 0.020833334, %v1382_v48 }
 0x7a7   :  { %v1384_v50 = vadd.f32 1e-05, %v1383_v49 }
 0x7a8   :  { %v1396_v58 = vpop.permute.xlu1 %1395 }
 0x7a9   :  { %2326 = vrsqrt.f32 %v1384_v50 }
 0x7b6   :  { %v2327_v52 = vpop.eup %2326 }
 0x7b7   :  { %v1386_v53 = vmul.f32 %v2327_v52, %v177_v51 }
 0x7b9   :  { %1389 = vperm.xlu0 %2324, %v1386_v53  }
 0x834   :  { %v1390_v55 = vpop.permute.xlu0 %1389 }
 0x835   :  { %v1392_v56 = vmul.f32 %v1390_v55, %v1375_v41  ;;  %v1629_v57 = vmul.f32 %v1390_v55, %v1377_v42 }
 0x837   :  { %v1398_v18 = vadd.f32 %v1396_v58, %v1392_v56  ;;  %v1630_v59 = vadd.f32 %v1629_v57, %v1396_v58 }
 0x839   :  { %v1399_v19 = vmax.f32 %v1398_v18, 0.0  ;;  %v1631_v21 = vmax.f32 %v1630_v59, 0.0 }
 0x83b   :  { %2243 = vmatprep.subr.mxu1 %v1399_v19  ;;  %2275 = vmatprep.subr.mxu0 %v1631_v21 }
 0x83c   :  { %2244 = vmatpush3.msra.mxu1 %v1399_v19  ;;  %2276 = vmatpush3.msra.mxu0 %v1631_v21 }
 0x83d   :  { %2246 = vmatmul.mubr.msk.f32.vlgmr.msra.gmra.mxu1 %vm1400_vm9, %v169_v60  ;;  %2278 = vmatmul.mubr.msk.f32.vlgmr.msra.gmra.mxu0 %vm1400_vm9, %v169_v60 }
 0x83e   :  { %2248 = vmatprep.mubr.msk.f32.mxu1 %vm1400_vm9, %v170_v23  ;;  %2280 = vmatprep.mubr.msk.f32.mxu0 %vm1400_vm9, %v170_v23 }
 0x83f   :  { %2254 = vmatprep.subr.mxu1 %v152_v63  ;;  %2286 = vmatprep.subr.mxu0 %v152_v63 }
 0x840   :  { %2255 = vmatpush3.msra.mxu1 %v152_v63  ;;  %2287 = vmatpush3.msra.mxu0 %v152_v63 }
 0x841   :  { %2249 = vmatmul.mubr.msk.f32.gmra.mxu1 %vm1400_vm9, %v171_v61  ;;  %2281 = vmatmul.mubr.msk.f32.gmra.mxu0 %vm1400_vm9, %v171_v61 }
 0x842   :  { %2251 = vmatprep.mubr.msk.f32.mxu1 %vm1400_vm9, %v172_v25  ;;  %2283 = vmatprep.mubr.msk.f32.mxu0 %vm1400_vm9, %v172_v25 }
 0x843   :  { %2256 = vmatprep.subr.mxu1 %v151_v27  ;;  %2288 = vmatprep.subr.mxu0 %v151_v27 }
 0x844   :  { %2257 = vmatpush3.msra.mxu1 %v151_v27  ;;  %2289 = vmatpush3.msra.mxu0 %v151_v27 }
 0x845   :  { %2252 = vmatmul.mubr.msk.f32.gmra.mxu1 %vm1400_vm9, %v173_v62  ;;  %2284 = vmatmul.mubr.msk.f32.gmra.mxu0 %vm1400_vm9, %v173_v62 }
 0x846   :  { %2258 = vmatprep.subr.mxu1 %v150_v29  ;;  %2290 = vmatprep.subr.mxu0 %v150_v29 }
 0x847   :  { %2259 = vmatpush3.msra.mxu1 %v150_v29  ;;  %2291 = vmatpush3.msra.mxu0 %v150_v29 }
 0x848   :  { %2260 = vmatprep.subr.mxu1 %v149_v0  ;;  %2292 = vmatprep.subr.mxu0 %v149_v0 }
 0x849   :  { %2261 = vmatpush3.msra.mxu1 %v149_v0  ;;  %2293 = vmatpush3.msra.mxu0 %v149_v0 }
 0x84a   :  { %2262 = vmatprep.subr.mxu1 %v148_v1  ;;  %2294 = vmatprep.subr.mxu0 %v148_v1 }
 0x84b   :  { %2263 = vmatpush3.msra.mxu1 %v148_v1  ;;  %2295 = vmatpush3.msra.mxu0 %v148_v1 }
 0x84c   :  { %2264 = vmatprep.subr.mxu1 %v147_v2  ;;  %2296 = vmatprep.subr.mxu0 %v147_v2 }
 0x84d   :  { %2265 = vmatpush3.msra.mxu1 %v147_v2  ;;  %2297 = vmatpush3.msra.mxu0 %v147_v2 }
 0x84e   :  { %2266 = vmatprep.subr.mxu1 %v146_v31  ;;  %2298 = vmatprep.subr.mxu0 %v146_v31 }
 0x84f   :  { %2267 = vmatpush3.msra.mxu1 %v146_v31  ;;  %2299 = vmatpush3.msra.mxu0 %v146_v31 }
 0x850   :  { %2268 = vmatprep.subr.mxu1 %v145_v5  ;;  %2300 = vmatprep.subr.mxu0 %v145_v5 }
 0x851   :  { %2269 = vmatpush3.msra.mxu1 %v145_v5  ;;  %2301 = vmatpush3.msra.mxu0 %v145_v5 }
 0x852   :  { %2270 = vmatprep.subr.mxu1 %v144_v9  ;;  %2302 = vmatprep.subr.mxu0 %v144_v9 }
 0x853   :  { %2271 = vmatpush3.msra.mxu1 %v144_v9  ;;  %2303 = vmatpush3.msra.mxu0 %v144_v9 }
 0x8fd   :  { %v2247_v33 = vpop.f32.mrf.mxu1  ;;  %v2279_v3 = vpop.f32.mrf.mxu0 }
 0x8ff   :  { %v1485_v6 = vpop.f32.mrf.mxu1  ;;  %v1698_v8 = vpop.f32.mrf.mxu0 }
 0x901   :  { %v2250_v10 = vpop.f32.mrf.mxu1  ;;  %v2282_v11 = vpop.f32.mrf.mxu0 }
 0x902   :  { %1518 = vrot.lane.b32.xlu0 %v2250_v10, %s2489_s5 }
 0x903   :  { %v1495_v12 = vpop.f32.mrf.mxu1  ;;  %v1708_v13 = vpop.f32.mrf.mxu0 }
 0x904   :  { %1729 = vrot.lane.b32.xlu1 %v1708_v13, %s2489_s5 }
 0x905   :  { %v2253_v4 = vpop.f32.mrf.mxu1  ;;  %v2285_v14 = vpop.f32.mrf.mxu0 }
 0x906   :  { %1731 = vrot.lane.b32.xlu0 %v2282_v11, %s2489_s5 }
 0x907   :  { %v1505_v7 = vpop.f32.mrf.mxu1  ;;  %v1718_v15 = vpop.f32.mrf.mxu0 }
 0x908   :  { %1524 = vrot.lane.b32.xlu1 %v1505_v7, %s2493_s18 }
 0x90a   :  { %1516 = vrot.lane.b32.xlu0 %v1495_v12, %s2489_s5  ;;  %s1838_s5 = sshll.u32 %s2494_s15, 4  ;;  %s1839_s5 = int_to_ptr.vmem [resolvable:$true] %s1838_s5 }
 0x90b   :  { %p2453_p3 = scmp.lt.s32.totalorder %s1839_s5, %s1839_s5 }
 0x90c   :  { %1737 = vrot.lane.b32.xlu1 %v1718_v15, %s2493_s18 }
 0x90e   :  { %1526 = vrot.lane.b32.xlu0 %v2253_v4, %s2493_s18 }
 0x910   :  { %1739 = vrot.lane.b32.xlu1 %v2285_v14, %s2493_s18  ;;  %s2448_s18 = scalar_lea.vmem %s1839_s5, 512 }
 0x911   :  { %p2449_p2 = scmp.ne.s32.totalorder %s1839_s5, %s2448_s18  ;;  %p2454_p4 = scmp.lt.s32.totalorder %s2448_s18, %s2448_s18 }
 0x912   :  { %1536 = vperm.xlu0 %2324, %v179_v20  }
 0x913   :  { %p2455_p5 = por %p2454_p4, %p2453_p3 }
 0x914   :  { %1541 = vperm.xlu1 %2325, %v180_v22  }
 0x915   :  { %p2456_p6 = pnand %p2455_p5, %p2449_p2 }
 0x974   :  { %v1519_v24 = vpop.permute.xlu0 %1518 }
 0x975   :  { %v1531_v37 = vsel %vm184_vm0, %v2247_v33, %v1519_v24 }
 0x976   :  { %v1730_v16 = vpop.permute.xlu1 %1729 }
 0x977   :  { %v1743_v32 = vsel %vm184_vm0, %v1698_v8, %v1730_v16 }
 0x978   :  { %v1732_v26 = vpop.permute.xlu0 %1731 }
 0x979   :  { %v1744_v40 = vsel %vm184_vm0, %v2279_v3, %v1732_v26 }
 0x97a   :  { %v1525_v28 = vpop.permute.xlu1 %1524 }
 0x97c   :  { %v1517_v30 = vpop.permute.xlu0 %1516 }
 0x97d   :  { %v1530_v17 = vsel %vm184_vm0, %v1485_v6, %v1517_v30 }
 0x97e   :  { %v1738_v34 = vpop.permute.xlu1 %1737  ;;  %v1532_v35 = vsel %vm323_vm6, %v1530_v17, %v1525_v28 }
 0x97f   :  { %v1745_v36 = vsel %vm323_vm6, %v1743_v32, %v1738_v34  ;;  %2272 = vmatprep.mubr.msk.f32.mxu1 %vm332_vm7, %v1532_v35 }
 0x980   :  { %v1527_v38 = vpop.permute.xlu0 %1526  ;;  %2304 = vmatprep.mubr.msk.f32.mxu0 %vm332_vm7, %v1745_v36 }
 0x981   :  { %v1533_v39 = vsel %vm323_vm6, %v1531_v37, %v1527_v38 }
 0x982   :  { %2273 = vmatmul.mubr.msk.f32.vlgmr.msra.gmra.mxu1 %vm332_vm7, %v1533_v39  ;;  %v1740_v41 = vpop.permute.xlu1 %1739 }
 0x983   :  { %v1746_v42 = vsel %vm323_vm6, %v1744_v40, %v1740_v41 }
 0x984   :  { %2305 = vmatmul.mubr.msk.f32.vlgmr.msra.gmra.mxu0 %vm332_vm7, %v1746_v42 }
 0x98d   :  { %v1537_v45 = vpop.permute.xlu0 %1536 }
 0x98f   :  { %v1542_v43 = vpop.permute.xlu1 %1541 }
 0xa42   :  { %v2274_v44 = vpop.f32.mrf.mxu1 }
 0xa43   :  { %v1622_v46 = vadd.f32 %v2274_v44, %v1542_v43 }
 0xa44   :  { %v1616_v47 = vpop.f32.mrf.mxu1  ;;  %v2306_v48 = vpop.f32.mrf.mxu0 }
 0xa45   :  { %v1626_v49 = vmax.f32 %v1622_v46, 0.0  ;;  %v1617_v50 = vadd.f32 %v1616_v47, %v1537_v45  ;;  %v1825_v51 = vadd.f32 %v2306_v48, %v1542_v43 }
 0xa46   :  { %v1819_v52 = vpop.f32.mrf.mxu0 }
 0xa47   :  { %1628 = vst.msk [vmem:[#allocation13 + $0x8] sm:$0xff] %vm184_vm0, %v1626_v49  ;;  %v1625_v53 = vmax.f32 %v1617_v50, 0.0  ;;  %v1829_v54 = vmax.f32 %v1825_v51, 0.0  ;;  %v1820_v55 = vadd.f32 %v1819_v52, %v1537_v45 }
 0xa49   :  { %1627 = vst.msk [vmem:[#allocation13] sm:$0xff] %vm184_vm0, %v1625_v53  ;;  %1832 = vst.msk [vmem:[#allocation13 + $0x18] sm:$0xff] %vm184_vm0, %v1829_v54  ;;  %v1828_v56 = vmax.f32 %v1820_v55, 0.0 }
 0xa4b   :  { %1831 = vst.msk [vmem:[#allocation13 + $0x10] sm:$0xff] %vm184_vm0, %v1828_v56 }
 0xa4c   :  { %2459 = shalt.err (!%p2456_p6)
}
 0xa4d   :  { %1844 = dma.vmem_to_hbm [thread:$0]  %s1839_s5, 512, %s3127_s16, [#allocation4], %s2482_s9, %s2482_s9, %s2483_s23  }
 0xa4e   :  { %2476 = dma.done.wait [#allocation4], 512  }
 0xa4f   :  { %2477 = vsyncadd [#allocation4], 4294966784 }
 0xa50   :  { %1848 = vsyncpa [#allocation3], 1 }
 0xa51   :  { %1849 = vsyncpa [#allocation6], 1 }
 0xa52   :  { %1850 = vsyncpa [#allocation9], 1 }
 0xa53   :  { %1851 = vsyncpa [#allocation12], 1 }
 0xa54   :  { %1852 = vsyncpa [#allocation4], 1 }

</bundles_post_ra>
